<compile_context>
chip_gen: v7x
topology: tpu7x:2x2x1
jax: 0.10.0
libtpu: 0.0.40
codegen_flags: <defaults>
</compile_context>

<pallas_src>
import jax
import jax.numpy as jnp
from jax import lax
from jax.experimental import pallas as pl
from jax.experimental.pallas import tpu as pltpu


# --------------------------- in-kernel math helpers ------------------------- #

def _softmax_rows(scores):
    m = jnp.max(scores, axis=1, keepdims=True)
    e = jnp.exp(scores - m)
    denom = jnp.sum(e, axis=1, keepdims=True)
    return e * pl.reciprocal(denom, approx=False)   # exact, keeps tight tolerances


def _addressing_math(c, km):
    # scores[b, m] = sum_d c[b, d] * km[m, d] -- contract shared D axis, no .T
    scores = lax.dot_general(c, km, (((1,), (1,)), ((), ())),
                             preferred_element_type=jnp.float32)
    return _softmax_rows(scores)


def _erase_add(c, w_ea, b_ea):
    # fused erase/add Linear: one (tb, D) @ (D, 2D) MXU push (pre-transposed W)
    d = c.shape[-1]
    ea = lax.dot_general(c, w_ea, (((1,), (0,)), ((), ())),
                         preferred_element_type=jnp.float32) + b_ea
    return jax.nn.sigmoid(ea[:, :d]), jnp.tanh(ea[:, d:])


def _weighted_read(wb, mem):
    # read[b, d] = sum_m w[b, m] * mem[b, m, d]
    # VPU multiply + sublane (M-axis) reduce; mem is already VMEM-resident.
    return jnp.sum(wb * mem, axis=1)


def _memory_update(mem, wb, erase, add):
    # mem*(1 - w⊗erase) + w⊗add == mem + w⊗(add - mem*erase)  (minimal stores)
    return mem + wb * (add[:, None, :] - mem * erase[:, None, :])


# ------------------------------ kernels ------------------------------------- #

def _addressing_kernel(c_ref, km_ref, w_out_ref):
    w_out_ref[...] = _addressing_math(c_ref[...], km_ref[...]).astype(w_out_ref.dtype)


def _read_kernel(w_ref, mem_ref, out_ref):
    mem = mem_ref[...].astype(jnp.float32)
    out_ref[...] = _weighted_read(w_ref[...][:, :, None], mem).astype(out_ref.dtype)


def _write_kernel(c_ref, mem_ref, w_ref, wea_ref, bea_ref, mem_out_ref):
    mem = mem_ref[...].astype(jnp.float32)
    erase, add = _erase_add(c_ref[...], wea_ref[...], bea_ref[...])
    wb = w_ref[...][:, :, None]
    mem_out_ref[...] = _memory_update(mem, wb, erase, add).astype(mem_out_ref.dtype)


def _fused_kernel(c_ref, km_ref, mem_ref, wea_ref, bea_ref,
                  w_out_ref, read_out_ref, mem_out_ref):
    # addressing + read + write in one pass; value memory streamed once.
    c = c_ref[...]
    mem = mem_ref[...].astype(jnp.float32)
    w = _addressing_math(c, km_ref[...])
    wb = w[:, :, None]                               # broadcast once, used twice
    w_out_ref[...] = w.astype(w_out_ref.dtype)
    read_out_ref[...] = _weighted_read(wb, mem).astype(read_out_ref.dtype)
    erase, add = _erase_add(c, wea_ref[...], bea_ref[...])
    mem_out_ref[...] = _memory_update(mem, wb, erase, add).astype(mem_out_ref.dtype)


def _precompute_kernel(c_ref, km_ref, wea_ref, bea_ref,
                       w_out_ref, e_out_ref, a_out_ref):
    # sequence-invariant work (depends only on control input): hoisted out of
    # the recurrent SKVMN loop and done for all timesteps in one launch.
    c = c_ref[...]
    w_out_ref[...] = _addressing_math(c, km_ref[...]).astype(w_out_ref.dtype)
    erase, add = _erase_add(c, wea_ref[...], bea_ref[...])
    e_out_ref[...] = erase.astype(e_out_ref.dtype)
    a_out_ref[...] = add.astype(a_out_ref.dtype)


def _step_kernel(w_ref, e_ref, a_ref, mem_ref, read_out_ref, mem_out_ref):
    # per-timestep, purely memory-bound part: read (old memory) + update.
    mem = mem_ref[...].astype(jnp.float32)
    wb = w_ref[...][:, :, None]
    read_out_ref[...] = _weighted_read(wb, mem).astype(read_out_ref.dtype)
    mem_out_ref[...] = _memory_update(mem, wb, e_ref[...], a_ref[...]
                                      ).astype(mem_out_ref.dtype)


# ------------------------------ spec helpers --------------------------------- #

def _row_spec(tb, *rest):
    """Block over the batch (grid) axis, full extent on the remaining axes."""
    nrest = len(rest)
    return pl.BlockSpec((tb,) + tuple(rest), lambda i, _n=nrest: (i,) + (0,) * _n)


def _param_spec(shape):
    """Same (full) block for every grid step (replicated parameters)."""
    n = len(shape)
    return pl.BlockSpec(tuple(shape), lambda i, _n=n: (0,) * _n)
    # NOTE: pipeline_mode=pl.Buffered(1) would halve the param VMEM footprint;
    # left at the default double-buffering for maximum portability.


def _round_up(n, m):
    return ((n + m - 1) // m) * m


def _pad_rows(x, rows):
    b = x.shape[0]
    if b == rows:
        return x
    return jnp.pad(x, [(0, rows - b)] + [(0, 0)] * (x.ndim - 1))


def _vmem_budget_bytes():
    """Generation-aware VMEM budget: ~3/4 of physical, conservative fallback."""
    try:
        cap = int(pltpu.get_tpu_info().vmem_capacity_bytes)
    except Exception:
        cap = 64 * 1024 * 1024          # v7x-safe assumption
    return max(32 * 1024 * 1024, min((cap * 3) // 4, 96 * 1024 * 1024))


def _pick_batch_tile(B, target, row_bytes, param_bytes, budget):
    """Batch tile: multiple of 8 (sublane-legal), fits the VMEM budget, and
    leaves >= 2 grid steps when B > 8 so both v7x TensorCores get work."""
    if B <= 8:
        return B                                   # full-extent block is legal
    cap = (budget - param_bytes) // max(row_bytes, 1)
    cap = max(8, min(target, cap))
    cap = min(cap, max(8, B // 2))                 # >= 2 parallel grid steps
    return max(8, (cap // 8) * 8)


# ------------------------------ module --------------------------------------- #

class DKVMNHeadGroupPallas:
    def __init__(self, memory_size, memory_state_dim, is_write, key=None,
                 block_batch=128):
        self.memory_size = memory_size
        self.memory_state_dim = memory_state_dim
        self.is_write = is_write
        self.block_batch = block_batch
        self.vmem_budget = _vmem_budget_bytes()
        if self.is_write:
            if key is None:
                key = jax.random.PRNGKey(0)
            ke, ka = jax.random.split(key)
            d = memory_state_dim
            std = (2.0 / d) ** 0.5      # kaiming_normal_, fan_in, relu gain
            # stored PRE-TRANSPOSED and fused: y = x @ [We.T | Wa.T] + [be | ba]
            erase_wT = std * jax.random.normal(ke, (d, d), jnp.float32)
            add_wT = std * jax.random.normal(ka, (d, d), jnp.float32)
            self.w_ea = jnp.concatenate([erase_wT, add_wT], axis=1)   # (D, 2D)
            self.b_ea = jnp.zeros((1, 2 * d), jnp.float32)            # (1, 2D)

    # ---- tiling -------------------------------------------------------------
    def _tile(self, B, mem_itemsize=4, streams_mem=2):
        M, D = self.memory_size, self.memory_state_dim
        # double-buffered per-batch-row streams (memory in/out dominate)
        row = 2 * (streams_mem * M * D * mem_itemsize + 4 * D * 4 + 2 * M * 4)
        params = 2 * 4 * (M * D + 2 * D * D + 2 * D)
        return _pick_batch_tile(B, self.block_batch, row, params, self.vmem_budget)

    def _cparams(self):
        return pltpu.CompilerParams(
            dimension_semantics=("parallel",),          # batch tiles independent
            vmem_limit_bytes=int(self.vmem_budget))

    # ---- addressing: (B, D) x (M, D) -> softmax -> (B, M) -------------------
    def addressing(self, control_input, key_memory):
        B, D = control_input.shape
        M = self.memory_size
        tb = self._tile(B, streams_mem=0)
        Bp = _round_up(B, tb)
        out = pl.pallas_call(
            _addressing_kernel,
            grid=(Bp // tb,),
            in_specs=[_row_spec(tb, D), _param_spec((M, D))],
            out_specs=_row_spec(tb, M),
            out_shape=jax.ShapeDtypeStruct((Bp, M), jnp.float32),
            compiler_params=self._cparams(),
        )(_pad_rows(control_input, Bp), key_memory)
        return out[:B]

    # ---- read: memory (>=B, M, D), read_weight (B, M) -> (B, D) -------------
    def read(self, memory, control_input=None, read_weight=None, key_memory=None):
        if read_weight is None:
            read_weight = self.addressing(control_input, key_memory)
        B, M = read_weight.shape
        D = self.memory_state_dim
        tb = self._tile(B, memory.dtype.itemsize, streams_mem=1)
        Bp = _round_up(B, tb)
        mem = memory if memory.shape[0] >= Bp else _pad_rows(memory, Bp)
        out = pl.pallas_call(
            _read_kernel,
            grid=(Bp // tb,),
            in_specs=[_row_spec(tb, M), _row_spec(tb, M, D)],
            out_specs=_row_spec(tb, D),
            out_shape=jax.ShapeDtypeStruct((Bp, D), jnp.float32),
            compiler_params=self._cparams(),
        )(_pad_rows(read_weight, Bp), mem)
        return out[:B]

    # ---- write: control (B, D), memory (Bm, M, D), weight (B, M) ------------
    def _write_call(self, c, mem, w, tb, out_rows):
        M, D = self.memory_size, self.memory_state_dim
        return pl.pallas_call(
            _write_kernel,
            grid=(c.shape[0] // tb,),
            in_specs=[_row_spec(tb, D), _row_spec(tb, M, D), _row_spec(tb, M),
                      _param_spec((D, 2 * D)), _param_spec((1, 2 * D))],
            out_specs=_row_spec(tb, M, D),
            out_shape=jax.ShapeDtypeStruct((out_rows, M, D), mem.dtype),
            # rows >= grid coverage keep their input values through the alias;
            # donate the memory at the call site to avoid a defensive copy.
            input_output_aliases={1: 0},
            compiler_params=self._cparams(),
        )(c, mem, w, self.w_ea, self.b_ea)

    def write(self, control_input, memory, write_weight=None, key_memory=None):
        assert self.is_write
        if write_weight is None:
            write_weight = self.addressing(control_input, key_memory)
        B, D = control_input.shape
        Bm = memory.shape[0]
        tb = self._tile(B, memory.dtype.itemsize)
        Bp = _round_up(B, tb)
        if Bp == B:
            return self._write_call(control_input, memory, write_weight, tb, Bm)
        # ragged batch: pad to a sublane-legal tile, run on a padded copy of the
        # first B rows, reattach the untouched tail.
        m = self._write_call(_pad_rows(control_input, Bp),
                             _pad_rows(memory[:B], Bp),
                             _pad_rows(write_weight, Bp), tb, Bp)[:B]
        return m if Bm == B else jnp.concatenate([m, memory[B:]], axis=0)

    # ---- fused addressing + read + write (single launch) --------------------
    def _fused_call(self, c, km, mem, tb, out_rows):
        M, D = self.memory_size, self.memory_state_dim
        Bp = c.shape[0]
        return pl.pallas_call(
            _fused_kernel,
            grid=(Bp // tb,),
            in_specs=[_row_spec(tb, D), _param_spec((M, D)), _row_spec(tb, M, D),
                      _param_spec((D, 2 * D)), _param_spec((1, 2 * D))],
            out_specs=[_row_spec(tb, M), _row_spec(tb, D), _row_spec(tb, M, D)],
            out_shape=(jax.ShapeDtypeStruct((Bp, M), jnp.float32),
                       jax.ShapeDtypeStruct((Bp, D), jnp.float32),
                       jax.ShapeDtypeStruct((out_rows, M, D), mem.dtype)),
            input_output_aliases={2: 2},
            compiler_params=self._cparams(),
        )(c, km, mem, self.w_ea, self.b_ea)

    def addressing_read_write(self, control_input, key_memory, memory):
        """Returns (correlation_weight, read_content, new_memory) in one launch."""
        assert self.is_write
        B, D = control_input.shape
        Bm = memory.shape[0]
        tb = self._tile(B, memory.dtype.itemsize)
        Bp = _round_up(B, tb)
        if Bp == B:
            return self._fused_call(control_input, key_memory, memory, tb, Bm)
        w, r, m = self._fused_call(_pad_rows(control_input, Bp), key_memory,
                                   _pad_rows(memory[:B], Bp), tb, Bp)
        m = m[:B]
        if Bm > B:
            m = jnp.concatenate([m, memory[B:]], axis=0)
        return w[:B], r[:B], m

    # ---- hoisted-sequence API -----------------------------------------------
    def precompute_controls(self, control_flat, key_memory):
        """Addressing + erase/add for all (B*T) rows in one lane-dense launch."""
        assert self.is_write
        N, D = control_flat.shape
        M = self.memory_size
        tb = self._tile(N, streams_mem=0)
        Np = _round_up(N, tb)
        w, e, a = pl.pallas_call(
            _precompute_kernel,
            grid=(Np // tb,),
            in_specs=[_row_spec(tb, D), _param_spec((M, D)),
                      _param_spec((D, 2 * D)), _param_spec((1, 2 * D))],
            out_specs=[_row_spec(tb, M), _row_spec(tb, D), _row_spec(tb, D)],
            out_shape=(jax.ShapeDtypeStruct((Np, M), jnp.float32),
                       jax.ShapeDtypeStruct((Np, D), jnp.float32),
                       jax.ShapeDtypeStruct((Np, D), jnp.float32)),
            compiler_params=self._cparams(),
        )(_pad_rows(control_flat, Np), key_memory, self.w_ea, self.b_ea)
        return w[:N], e[:N], a[:N]

    def _step_call(self, w, e, a, mem, tb, out_rows):
        M, D = self.memory_size, self.memory_state_dim
        return pl.pallas_call(
            _step_kernel,
            grid=(w.shape[0] // tb,),
            in_specs=[_row_spec(tb, M), _row_spec(tb, D), _row_spec(tb, D),
                      _row_spec(tb, M, D)],
            out_specs=[_row_spec(tb, D), _row_spec(tb, M, D)],
            out_shape=(jax.ShapeDtypeStruct((w.shape[0], D), jnp.float32),
                       jax.ShapeDtypeStruct((out_rows, M, D), mem.dtype)),
            input_output_aliases={3: 1},
            compiler_params=self._cparams(),
        )(w, e, a, mem)

    def step_read_write(self, write_weight, erase, add, memory):
        """Per-timestep memory-bound part (read old memory + erase/add update)."""
        B, M = write_weight.shape
        Bm = memory.shape[0]
        tb = self._tile(B, memory.dtype.itemsize)
        Bp = _round_up(B, tb)
        if Bp == B:
            return self._step_call(write_weight, erase, add, memory, tb, Bm)
        r, m = self._step_call(_pad_rows(write_weight, Bp), _pad_rows(erase, Bp),
                               _pad_rows(add, Bp), _pad_rows(memory[:B], Bp),
                               tb, Bp)
        m = m[:B]
        if Bm > B:
            m = jnp.concatenate([m, memory[B:]], axis=0)
        return r[:B], m


# --------------------------- pure-JAX reference ------------------------------ #

def _ref_addressing(c, km):
    return jax.nn.softmax(c @ km.T, axis=1)


def _ref_read(w, mem):
    return jnp.einsum('bm,bmd->bd', w, mem)


def _ref_write(c, mem, w, w_ea, b_ea, d):
    ea = c @ w_ea + b_ea
    erase = jax.nn.sigmoid(ea[:, :d])
    add = jnp.tanh(ea[:, d:])
    em = erase[:, None, :] * w[:, :, None]
    am = add[:, None, :] * w[:, :, None]
    return mem * (1.0 - em) + am


# ------------------------------ main ------------------------------------------ #

if __name__ == "__main__":
    # keep both the reference and in-kernel f32 matmuls at full f32 precision
    jax.config.update("jax_default_matmul_precision", "highest")

    B, M, D, T = 16, 32, 128, 2
    key = jax.random.PRNGKey(0)
    ks = jax.random.split(key, 7)

    control = jax.random.normal(ks[0], (B, D), jnp.float32)
    key_memory = jax.random.normal(ks[1], (M, D), jnp.float32)
    value_memory = jax.random.normal(ks[2], (B, M, D), jnp.float32)

    head = DKVMNHeadGroupPallas(memory_size=M, memory_state_dim=D,
                                is_write=True, key=ks[3])

    # fused path (one launch); donate the memory so the alias is copy-free.
    fused = jax.jit(head.addressing_read_write, donate_argnums=(2,))
    corr_w, read_content, new_memory = fused(control, key_memory,
                                             value_memory + 0.0)

    # standalone API parity (matches the torch module's methods)
    w_sep = head.addressing(control, key_memory)
    r_sep = head.read(value_memory, read_weight=w_sep)
    m_sep = head.write(control, value_memory, write_weight=w_sep)

    # write into a larger value memory (Bm > B): aliased untouched tail rows
    Bm = 24
    big_memory = jax.random.normal(ks[4], (Bm, M, D), jnp.float32)
    m_big = head.write(control, big_memory, write_weight=w_sep)

    # ragged batch (padding path instead of one oversized block)
    Br = 10
    control_r = jax.random.normal(ks[5], (Br, D), jnp.float32)
    w_rag = head.addressing(control_r, key_memory)

    # bf16 value-memory path (halves HBM traffic on the dominant tensor)
    vm_bf16 = value_memory.astype(jnp.bfloat16)
    w_bf, r_bf, m_bf = head.addressing_read_write(control, key_memory, vm_bf16)

    # hoisted-sequence path: precompute addressing + erase/add for all steps,
    # keep only the memory-bound read+update in the per-step kernel.
    ctrl_seq = jax.random.normal(ks[6], (T, B, D), jnp.float32)
    w_all, e_all, a_all = head.precompute_controls(
        ctrl_seq.reshape(T * B, D), key_memory)
    w_all = w_all.reshape(T, B, M)
    e_all = e_all.reshape(T, B, D)
    a_all = a_all.reshape(T, B, D)
    step = jax.jit(head.step_read_write, donate_argnums=(3,))
    mem_t = value_memory + 0.0
    reads = []
    for t in range(T):
        r_t, mem_t = step(w_all[t], e_all[t], a_all[t], mem_t)
        reads.append(r_t)

    jax.block_until_ready((corr_w, read_content, new_memory, w_sep, r_sep,
                           m_sep, m_big, w_rag, w_bf, r_bf, m_bf, mem_t))

    # ---- verify against pure-JAX reference ----
    ref_w = _ref_addressing(control, key_memory)
    ref_r = _ref_read(ref_w, value_memory)
    ref_m = _ref_write(control, value_memory, ref_w, head.w_ea, head.b_ea, D)
    ref_big = jnp.concatenate(
        [_ref_write(control, big_memory[:B], ref_w, head.w_ea, head.b_ea, D),
         big_memory[B:]], axis=0)
    ref_w_rag = _ref_addressing(control_r, key_memory)

    tol = dict(atol=2e-3, rtol=2e-3)
    assert jnp.allclose(corr_w, ref_w, **tol)
    assert jnp.allclose(read_content, ref_r, **tol)
    assert jnp.allclose(new_memory, ref_m, **tol)
    assert jnp.allclose(w_sep, ref_w, **tol)
    assert jnp.allclose(r_sep, ref_r, **tol)
    assert jnp.allclose(m_sep, ref_m, **tol)
    assert jnp.allclose(m_big, ref_big, **tol)
    assert jnp.allclose(w_rag, ref_w_rag, **tol)

    # bf16 path: compare against the same math on the bf16-rounded memory
    vm_up = vm_bf16.astype(jnp.float32)
    btol = dict(atol=5e-2, rtol=5e-2)
    assert jnp.allclose(w_bf, ref_w, **btol)
    assert jnp.allclose(r_bf, _ref_read(ref_w, vm_up), **btol)
    assert jnp.allclose(m_bf.astype(jnp.float32),
                        _ref_write(control, vm_up, ref_w, head.w_ea, head.b_ea, D),
                        **btol)

    # hoisted-sequence path vs. a step-by-step reference loop
    mem_ref_t = value_memory
    for t in range(T):
        w_t = _ref_addressing(ctrl_seq[t], key_memory)
        r_ref_t = _ref_read(w_t, mem_ref_t)
        mem_ref_t = _ref_write(ctrl_seq[t], mem_ref_t, w_t,
                               head.w_ea, head.b_ea, D)
        assert jnp.allclose(reads[t], r_ref_t, **tol)
    assert jnp.allclose(mem_t, mem_ref_t, **tol)

    # TODO(synk): nn.Module.forward is `pass` in the reference; only the
    # addressing/read/write methods carry compute and are implemented here.
    print("KERNEL_OK")
</pallas_src>

<mosaic_0001>
module attributes {stable_mosaic.version = 11 : i64} {
  func.func @_fused_kernel(%arg0: i32, %arg1: memref<8x128xf32, #tpu.memory_space<vmem>>, %arg2: memref<32x128xf32, #tpu.memory_space<vmem>>, %arg3: memref<8x32x128xf32, #tpu.memory_space<vmem>>, %arg4: memref<128x256xf32, #tpu.memory_space<vmem>>, %arg5: memref<1x256xf32, #tpu.memory_space<vmem>>, %arg6: memref<8x32xf32, #tpu.memory_space<vmem>>, %arg7: memref<8x128xf32, #tpu.memory_space<vmem>>, %arg8: memref<8x32x128xf32, #tpu.memory_space<vmem>>) attributes {dimension_semantics = [#tpu.dimension_semantics<parallel>], iteration_bounds = array<i64: 2>, scalar_prefetch = 0 : i64, scratch_operands = 0 : i64, tpu.core_type = #tpu.core_type<tc>, window_params = [{transform_indices = @transform_0, window_bounds = array<i64: 8, 128>}, {pipeline_mode = #tpu.pipeline_mode<synchronous>, transform_indices = @transform_1, window_bounds = array<i64: 32, 128>}, {transform_indices = @transform_2, window_bounds = array<i64: 8, 32, 128>}, {pipeline_mode = #tpu.pipeline_mode<synchronous>, transform_indices = @transform_3, window_bounds = array<i64: 128, 256>}, {pipeline_mode = #tpu.pipeline_mode<synchronous>, transform_indices = @transform_4, window_bounds = array<i64: 1, 256>}, {transform_indices = @transform_5, window_bounds = array<i64: 8, 32>}, {transform_indices = @transform_6, window_bounds = array<i64: 8, 128>}, {transform_indices = @transform_7, window_bounds = array<i64: 8, 32, 128>}]} {
    %c0 = arith.constant 0 : index
    %c0_0 = arith.constant 0 : index
    %0 = vector.load %arg1[%c0, %c0_0] : memref<8x128xf32, #tpu.memory_space<vmem>>, vector<8x128xf32>
    %c0_1 = arith.constant 0 : index
    %c0_2 = arith.constant 0 : index
    %c0_3 = arith.constant 0 : index
    %1 = vector.load %arg3[%c0_1, %c0_2, %c0_3] : memref<8x32x128xf32, #tpu.memory_space<vmem>>, vector<8x32x128xf32>
    %c0_4 = arith.constant 0 : index
    %c0_5 = arith.constant 0 : index
    %2 = vector.load %arg2[%c0_4, %c0_5] : memref<32x128xf32, #tpu.memory_space<vmem>>, vector<32x128xf32>
    %cst = arith.constant dense<0.000000e+00> : vector<8x32xf32>
    %3 = tpu.matmul %0, %2, %cst {dimension_numbers = #tpu.dot_dimension_numbers<[1], [1], [0], [0], [0, 0, 1, 0], [], []>, precision = #tpu.contract_precision<fp32>} : vector<8x128xf32>, vector<32x128xf32>, vector<8x32xf32> -> vector<8x32xf32>
    %cst_6 = arith.constant dense<0xFF800000> : vector<8xf32>
    %4 = vector.multi_reduction <maximumf>, %3, %cst_6 [1] : vector<8x32xf32> to vector<8xf32>
    %5 = vector.shape_cast %4 : vector<8xf32> to vector<8x1xf32>
    %6 = vector.broadcast %5 : vector<8x1xf32> to vector<8x32xf32>
    %7 = arith.subf %3, %6 : vector<8x32xf32>
    %8 = math.exp %7 : vector<8x32xf32>
    %cst_7 = arith.constant dense<0.000000e+00> : vector<8xf32>
    %9 = vector.multi_reduction <add>, %8, %cst_7 [1] : vector<8x32xf32> to vector<8xf32>
    %10 = vector.shape_cast %9 : vector<8xf32> to vector<8x1xf32>
    %11 = tpu.reciprocal %10 : vector<8x1xf32> -> vector<8x1xf32>
    %12 = vector.broadcast %11 : vector<8x1xf32> to vector<8x32xf32>
    %13 = arith.mulf %8, %12 : vector<8x32xf32>
    %14 = vector.shape_cast %13 : vector<8x32xf32> to vector<8x32x1xf32>
    %c0_8 = arith.constant 0 : index
    %c0_9 = arith.constant 0 : index
    %15 = vector.load %arg6[%c0_8, %c0_9] : memref<8x32xf32, #tpu.memory_space<vmem>>, vector<8x32xf32>
    tpu.vector_store %arg6[%c0_8, %c0_9], %13 {strides = array<i32>} : memref<8x32xf32, #tpu.memory_space<vmem>>, vector<8x32xf32>,
    %16 = vector.broadcast %14 : vector<8x32x1xf32> to vector<8x32x128xf32>
    %17 = arith.mulf %16, %1 : vector<8x32x128xf32>
    %cst_10 = arith.constant dense<0.000000e+00> : vector<8x128xf32>
    %18 = vector.multi_reduction <add>, %17, %cst_10 [1] : vector<8x32x128xf32> to vector<8x128xf32>
    %c0_11 = arith.constant 0 : index
    %c0_12 = arith.constant 0 : index
    %19 = vector.load %arg7[%c0_11, %c0_12] : memref<8x128xf32, #tpu.memory_space<vmem>>, vector<8x128xf32>
    tpu.vector_store %arg7[%c0_11, %c0_12], %18 {strides = array<i32>} : memref<8x128xf32, #tpu.memory_space<vmem>>, vector<8x128xf32>,
    %c0_13 = arith.constant 0 : index
    %c0_14 = arith.constant 0 : index
    %20 = vector.load %arg4[%c0_13, %c0_14] : memref<128x256xf32, #tpu.memory_space<vmem>>, vector<128x256xf32>
    %c0_15 = arith.constant 0 : index
    %c0_16 = arith.constant 0 : index
    %21 = vector.load %arg5[%c0_15, %c0_16] : memref<1x256xf32, #tpu.memory_space<vmem>>, vector<1x256xf32>
    %cst_17 = arith.constant dense<0.000000e+00> : vector<8x256xf32>
    %22 = tpu.matmul %0, %20, %cst_17 {dimension_numbers = #tpu.dot_dimension_numbers<[1], [0], [0], [1], [0, 0, 1, 1], [], []>, precision = #tpu.contract_precision<fp32>} : vector<8x128xf32>, vector<128x256xf32>, vector<8x256xf32> -> vector<8x256xf32>
    %23 = vector.broadcast %21 : vector<1x256xf32> to vector<8x256xf32>
    %24 = arith.addf %22, %23 : vector<8x256xf32>
    %25 = vector.extract_strided_slice %24 {offsets = [0, 0], sizes = [8, 128], strides = [1, 1]} : vector<8x256xf32> to vector<8x128xf32>
    %26 = arith.negf %25 : vector<8x128xf32>
    %27 = math.exp %26 : vector<8x128xf32>
    %cst_18 = arith.constant 1.000000e+00 : f32
    %28 = vector.broadcast %cst_18 : f32 to vector<8x128xf32>
    %29 = arith.addf %28, %27 : vector<8x128xf32>
    %30 = arith.divf %28, %29 : vector<8x128xf32>
    %31 = vector.extract_strided_slice %24 {offsets = [0, 128], sizes = [8, 128], strides = [1, 1]} : vector<8x256xf32> to vector<8x128xf32>
    %32 = math.tanh %31 : vector<8x128xf32>
    %33 = vector.shape_cast %32 : vector<8x128xf32> to vector<8x1x128xf32>
    %34 = vector.shape_cast %30 : vector<8x128xf32> to vector<8x1x128xf32>
    %35 = vector.broadcast %34 : vector<8x1x128xf32> to vector<8x32x128xf32>
    %36 = arith.mulf %1, %35 : vector<8x32x128xf32>
    %37 = vector.broadcast %33 : vector<8x1x128xf32> to vector<8x32x128xf32>
    %38 = arith.subf %37, %36 : vector<8x32x128xf32>
    %39 = vector.broadcast %14 : vector<8x32x1xf32> to vector<8x32x128xf32>
    %40 = arith.mulf %39, %38 : vector<8x32x128xf32>
    %41 = arith.addf %1, %40 : vector<8x32x128xf32>
    %c0_19 = arith.constant 0 : index
    %c0_20 = arith.constant 0 : index
    %c0_21 = arith.constant 0 : index
    %42 = vector.load %arg8[%c0_19, %c0_20, %c0_21] : memref<8x32x128xf32, #tpu.memory_space<vmem>>, vector<8x32x128xf32>
    tpu.vector_store %arg8[%c0_19, %c0_20, %c0_21], %41 {strides = array<i32>} : memref<8x32x128xf32, #tpu.memory_space<vmem>>, vector<8x32x128xf32>,
    return
  }
  func.func @transform_0(%arg0: i32) -> (i32, i32) {
    %c0_i32 = arith.constant 0 : i32
    %c0_i32_0 = arith.constant 0 : i32
    return %arg0, %c0_i32 : i32, i32
  }
  func.func @transform_1(%arg0: i32) -> (i32, i32) {
    %c0_i32 = arith.constant 0 : i32
    %c0_i32_0 = arith.constant 0 : i32
    %c0_i32_1 = arith.constant 0 : i32
    return %c0_i32, %c0_i32_0 : i32, i32
  }
  func.func @transform_2(%arg0: i32) -> (i32, i32, i32) {
    %c0_i32 = arith.constant 0 : i32
    %c0_i32_0 = arith.constant 0 : i32
    %c0_i32_1 = arith.constant 0 : i32
    return %arg0, %c0_i32, %c0_i32_0 : i32, i32, i32
  }
  func.func @transform_3(%arg0: i32) -> (i32, i32) {
    %c0_i32 = arith.constant 0 : i32
    %c0_i32_0 = arith.constant 0 : i32
    %c0_i32_1 = arith.constant 0 : i32
    return %c0_i32, %c0_i32_0 : i32, i32
  }
  func.func @transform_4(%arg0: i32) -> (i32, i32) {
    %c0_i32 = arith.constant 0 : i32
    %c0_i32_0 = arith.constant 0 : i32
    %c0_i32_1 = arith.constant 0 : i32
    return %c0_i32, %c0_i32_0 : i32, i32
  }
  func.func @transform_5(%arg0: i32) -> (i32, i32) {
    %c0_i32 = arith.constant 0 : i32
    %c0_i32_0 = arith.constant 0 : i32
    return %arg0, %c0_i32 : i32, i32
  }
  func.func @transform_6(%arg0: i32) -> (i32, i32) {
    %c0_i32 = arith.constant 0 : i32
    %c0_i32_0 = arith.constant 0 : i32
    return %arg0, %c0_i32 : i32, i32
  }
  func.func @transform_7(%arg0: i32) -> (i32, i32, i32) {
    %c0_i32 = arith.constant 0 : i32
    %c0_i32_0 = arith.constant 0 : i32
    %c0_i32_1 = arith.constant 0 : i32
    return %arg0, %c0_i32, %c0_i32_0 : i32, i32, i32
  }
}

</mosaic_0001>

<bundles_post_ra>
// kernel: addressing_read_write.1
= control target key start
LH: loop header
LB: loop body
LE: loop exit
PB: predicated region body
PF: predicated region fallthrough
CT: control target
= control target key end

     0   :  { %s5151_s0 = inlined_call_operand.hbm [shape: f32[16,128], index: 0, kind: input, shape index: {}]   ;;  %s5152_s1 = inlined_call_operand.hbm [shape: f32[32,128], index: 1, kind: input, shape index: {}]   ;;  %s5153_s2 = inlined_call_operand.hbm [shape: f32[16,32,128], index: 2, kind: input, shape index: {}, may-alias: {2,7}]   ;;  %s5154_s3 = inlined_call_operand.hbm [shape: f32[128,256], index: 3, kind: input, shape index: {}]   ;;  %s5155_s4 = inlined_call_operand.vmem [shape: f32[1,256], index: 4, kind: input, shape index: {}]   ;;  %s5156_s5 = inlined_call_operand.hbm [shape: f32[16,32], index: 5, kind: output, shape index: {0}]   ;;  %s5157_s6 = inlined_call_operand.hbm [shape: f32[16,128], index: 6, kind: output, shape index: {1}]   ;;  %s5158_s7 = inlined_call_operand.hbm [shape: f32[16,32,128], index: 7, kind: output, shape index: {2}, may-alias: {2,7}]  }
   0x1   :  { %5296 = sst [smem:[#allocation47_spill]] %s5151_s0 }
   0x2   :  { %13 = vsyncpa [#allocation3], 0 }
   0x3   :  { %15 = vsyncpa [#allocation3 + $0x1], 0 }
   0x4   :  { %16 = vsyncpa [#allocation6], 0 }
   0x5   :  { %17 = vsyncpa [#allocation4], 0 }
   0x6   :  { %19 = vsyncpa [#allocation4 + $0x1], 0 }
   0x7   :  { %20 = vsyncpa [#allocation11], 0 }
   0x8   :  { %22 = vsyncpa [#allocation11 + $0x1], 0  ;;  %s3461_s24 = smov 0   ;;  %s3463_s25 = smov 0  }
   0x9   :  { %s3465_s26 = smov 0   ;;  %s3467_s27 = smov 0  }
   0xa LB: > { %s3482_s28 = sadd.s32 4294967295, %s3402_s27   ;;  %s5160_s29 = sadd.s32 4294967294, %s3402_s27   ;;  %s3402_s27 = sphi %s3467_s27, %s5544_s27   ;;  %s3398_s26 = sphi %s3465_s26, %s5547_s26   ;;  %s3394_s25 = sphi %s3463_s25, %s5546_s25   ;;  %s3390_s24 = sphi %s3461_s24, %s5545_s24  }
   0xb   : > { %p48_p0 = scmp.ne.s32.totalorder %s3394_s25, %s3390_s24  ;;  %p5159_p1 = scmp.eq.s32.totalorder %s3482_s28, 0 }
   0xc   : > { %p167_p3 = scmp.eq.s32.totalorder %s5160_s29, 1  ;;  %p2667_p5 = scmp.ge.s32.totalorder %s3402_s27, 1 }
   0xd   : > { %p3493_p4 = por %p5159_p1, %p48_p0  ;;  %p226_p7 = scmp.lt.s32.totalorder %s3402_s27, 3 }
   0xe   : > { %p3498_p6 = por %p167_p3, %p48_p0  ;;  %s3404_s10 = smov [#allocation5]  }
   0xf   : > { %s5297_s30 = scalar_select %p3493_p4, 1, 0 }
  0x10   : > { %s5298_s8 = scalar_select %p3498_p6, 1, 0 }
  0x11   : > { %p3503_p8 = pnand %p2667_p5, %p226_p7  ;;  %s238_s11 = sshll.u32 %s3404_s10, 4  ;;  %s3507_s11 = int_to_ptr.vmem [resolvable:$true] %s238_s11 }
  0x12   : > { %5299 = sst [smem:[#allocation19_spill]] %s5298_s8  ;;  %s3519_s13 = sadd.s32 1, %s3402_s27  }
  0x13   : > { %s5300_s9 = scalar_select %p3503_p8, 1, 0 }
  0x14   : > { %p3064_p9 = pneg %p3503_p8  ;;  %5302 = sst [smem:[#allocation20_spill]] %s3519_s13 }
  0x15   : > { %s35_s14 = sadd.s32 1, %s3398_s26  ;;  %s32_s15 = ssub.s32 %s3402_s27, %s3519_s13 }
  0x16   : > { %p3514_p11 = pnand %p3064_p9, %p5159_p1  ;;  %s3148_s18 = scalar_lea.hbm %s5152_s1, 512 }
  0x17   : > { %p3149_p12 = scmp.ne.s32.totalorder %s5152_s1, %s3148_s18  ;;  %p3155_p5 = scmp.lt.u32.totalorder %s3148_s18, %s5152_s1 }
  0x18   : > { %p5166_p13 = pneg %p3514_p11 }
  0x1a   : > { %p3151_p0 = pnand %p5166_p13, %p3149_p12 }
  0x1c   : > { %p3152_p3 = pneg %p3151_p0 }
  0x1e   : > { %p3157_p7 = pnand %p3155_p5, %p3152_p3 }
  0x20   : > { %3160 = shalt.err (!%p3157_p7)
}
  0x21   : > { %s3161_s23 = scalar_lea.vmem %s3507_s11, 512  ;;  %p3169_p2 = scmp.lt.s32.totalorder %s3507_s11, %s3507_s11 }
  0x22   : > { %p3162_p9 = scmp.ne.s32.totalorder %s3507_s11, %s3161_s23  ;;  %p3170_p12 = scmp.lt.s32.totalorder %s3161_s23, %s3161_s23 }
  0x24   : > { %p3164_p10 = pnand %p3162_p9, %p5166_p13  ;;  %p3171_p0 = por %p3170_p12, %p3169_p2 }
  0x26   : > { %p3165_p1 = pneg %p3164_p10 }
  0x28   : > { %p3172_p6 = pnand %p3171_p0, %p3165_p1 }
  0x2a   : > { %3175 = shalt.err (!%p3172_p6)
}
  0x2b   : > { %s5164_s10 = smov 128   ;;  %s5165_s16 = smov 8  }
  0x2c   : > { %3067 = dma.hbm_to_vmem [thread:$0]  (!%p3514_p11), %s5152_s1, 512, %s3507_s11, [#allocation6], %s5164_s10, %s5164_s10, %s5165_s16  }
  0x2d   : > { %p33_p1 = scmp.eq.s32.totalorder %s32_s15, 0  ;;  %p42_p2 = scmp.ne.s32.totalorder %s3398_s26, %s3394_s25 }
  0x2e   : > { %p43_p6 = scmp.eq.s32.totalorder %s3402_s27, 0  ;;  %p3090_p10 = scmp.lt.s32.totalorder %s3402_s27, 2 }
  0x2f   : > { %s3559_s19 = scalar_select %p33_p1, %s3398_s26, %s35_s14  }
  0x30   : > { %p44_p3 = por %p43_p6, %p42_p2  ;;  %p5303_p5 = scmp.eq.s32.totalorder %s3482_s28, 1 }
  0x31   : > { %s268_s21 = sand.u32 1, %s3402_s27   ;;  %s270_s22 = sand.u32 1, %s3398_s26  }
  0x32   : > { %p3563_p7 = por %p5303_p5, %p42_p2  ;;  %s2671_s23 = sshll.u32 %s270_s22, 3 }
  0x33   : > { %s2672_s29 = sshll.u32 %s3402_s27, 7  ;;  %s5305_s0 = sld [smem:[#allocation47_spill]] }
  0x34   : > { %s5304_s20 = scalar_select %p3563_p7, 1, 0 }
  0x35   : > { %s272_s14 = scalar_lea.vmem [#allocation2], %s2671_s23  ;;  %p3577_p9 = pnand %p3090_p10, %p44_p3 }
  0x36   : > { %s279_s15 = sshll.u32 %s272_s14, 4  ;;  %s3581_s18 = sshll.u32 %s270_s22, 8  ;;  %s3575_s15 = int_to_ptr.vmem [resolvable:$true] %s279_s15 }
  0x37   : > { %s5306_s17 = scalar_select %p3577_p9, 1, 0 }
  0x38   : > { %s3583_s10 = scalar_lea.sflag [#allocation3], %s268_s21  ;;  %p5170_p0 = pneg %p3577_p9 }
  0x39   : > { %s3573_s11 = scalar_lea.hbm %s5305_s0, %s2672_s29  ;;  %s3181_s23 = scalar_lea.hbm %s5305_s0, 256 }
  0x3a   : > { %s3176_s29 = scalar_lea.hbm %s3573_s11, 128  ;;  %p3182_p6 = scmp.lt.u32.totalorder %s3573_s11, %s5305_s0 }
  0x3b   : > { %p3177_p12 = scmp.ne.s32.totalorder %s3573_s11, %s3176_s29  ;;  %p3183_p10 = scmp.lt.u32.totalorder %s3181_s23, %s3176_s29 }
  0x3c   : > { %p3185_p5 = scmp.lt.u32.totalorder %s3176_s29, %s3573_s11 }
  0x3d   : > { %p3179_p1 = pnand %p5170_p0, %p3177_p12  ;;  %p3184_p3 = por %p3183_p10, %p3182_p6 }
  0x3f   : > { %p3180_p2 = pneg %p3179_p1  ;;  %p3186_p13 = por %p3185_p5, %p3184_p3 }
  0x41   : > { %p3187_p7 = pnand %p3186_p13, %p3180_p2 }
  0x43   : > { %3190 = shalt.err (!%p3187_p7)
}
  0x44   : > { %s3191_s21 = scalar_lea.vmem %s3575_s15, 128  ;;  %s3407_s22 = smov [#allocation2]  }
  0x45   : > { %p3192_p12 = scmp.ne.s32.totalorder %s3575_s15, %s3191_s21  ;;  %s3196_s8 = sshll.u32 %s3407_s22, 4  ;;  %s3197_s8 = int_to_ptr.vmem [resolvable:$false] %s3196_s8 }
  0x46   : > { %s3198_s16 = scalar_lea.vmem %s3197_s8, 256  ;;  %p3199_p8 = scmp.lt.s32.totalorder %s3575_s15, %s3197_s8 }
  0x47   : > { %p3194_p1 = pnand %p3192_p12, %p5170_p0  ;;  %p3200_p6 = scmp.lt.s32.totalorder %s3198_s16, %s3191_s21 }
  0x49   : > { %p3195_p4 = pneg %p3194_p1  ;;  %p3201_p10 = por %p3200_p6, %p3199_p8 }
  0x4b   : > { %p3202_p3 = pnand %p3201_p10, %p3195_p4 }
  0x4d   : > { %3205 = shalt.err (!%p3202_p3)
}
  0x4e   : > { %3074 = dma.hbm_to_vmem [thread:$0]  (!%p3577_p9), %s3573_s11, 128, %s3575_s15, %s3583_s10  }
  0x4f   : > { %s290_s29 = scalar_lea.vmem [#allocation7], %s3581_s18  ;;  %s3408_s23 = smov [#allocation8]  }
  0x50   : > { %s298_s13 = sshll.u32 %s290_s29, 4  ;;  %s251_s14 = sshll.u32 %s3408_s23, 4  ;;  %s3612_s13 = int_to_ptr.vmem [resolvable:$true] %s298_s13  ;;  %s252_s14 = int_to_ptr.vmem [resolvable:$true] %s251_s14 }
  0x51   : > { %s3206_s8 = scalar_lea.hbm %s5154_s3, 4096  ;;  %p5307_p8 = pneg %p3514_p11 }
  0x52   : > { %p3207_p4 = scmp.ne.s32.totalorder %s5154_s3, %s3206_s8  ;;  %p3213_p2 = scmp.lt.u32.totalorder %s3206_s8, %s5154_s3 }
  0x54   : > { %p3209_p13 = pnand %p3207_p4, %p5307_p8 }
  0x56   : > { %p3210_p7 = pneg %p3209_p13 }
  0x58   : > { %p3215_p5 = pnand %p3213_p2, %p3210_p7 }
  0x5a   : > { %3218 = shalt.err (!%p3215_p5)
}
  0x5b   : > { %s3219_s18 = scalar_lea.vmem %s252_s14, 4096  ;;  %p5308_p1 = pmov %p5307_p8 }
  0x5c   : > { %p3220_p12 = scmp.ne.s32.totalorder %s252_s14, %s3219_s18  ;;  %p3227_p3 = scmp.lt.s32.totalorder %s252_s14, %s252_s14 }
  0x5d   : > { %p3228_p0 = scmp.lt.s32.totalorder %s3219_s18, %s3219_s18 }
  0x5e   : > { %p3222_p6 = pnand %p3220_p12, %p5308_p1 }
  0x5f   : > { %p3229_p9 = por %p3228_p0, %p3227_p3 }
  0x60   : > { %p3223_p10 = pneg %p3222_p6 }
  0x62   : > { %p3230_p4 = pnand %p3229_p9, %p3223_p10 }
  0x64   : > { %3233 = shalt.err (!%p3230_p4)
}
  0x65   : > { %s3409_s0 = smov 256   ;;  %s3410_s29 = smov 16  }
  0x66   : > { %3070 = dma.hbm_to_vmem [thread:$0]  (!%p3514_p11), %s5154_s3, 4096, %s252_s14, [#allocation6], %s3409_s0, %s3409_s0, %s3410_s29  }
  0x67   : > { %s2697_s21 = sshll.u32 %s3402_s27, 12  ;;  %p5309_p0 = scmp.ne.s32.totalorder %s5306_s17, 0 }
  0x68   : > { %s3638_s11 = scalar_lea.hbm %s5153_s2, %s2697_s21  ;;  %s3239_s14 = scalar_lea.hbm %s5153_s2, 8192 }
  0x69   : > { %s3234_s15 = scalar_lea.hbm %s3638_s11, 4096  ;;  %p5310_p8 = pneg %p5309_p0 }
  0x6a   : > { %p3235_p9 = scmp.ne.s32.totalorder %s3638_s11, %s3234_s15  ;;  %p3240_p11 = scmp.lt.u32.totalorder %s3638_s11, %s5153_s2 }
  0x6b   : > { %p3241_p2 = scmp.lt.u32.totalorder %s3239_s14, %s3234_s15  ;;  %p3243_p12 = scmp.lt.u32.totalorder %s3234_s15, %s3638_s11 }
  0x6c   : > { %p3237_p13 = pnand %p3235_p9, %p5310_p8 }
  0x6d   : > { %p3242_p5 = por %p3241_p2, %p3240_p11 }
  0x6e   : > { %p3238_p7 = pneg %p3237_p13 }
  0x6f   : > { %p3244_p1 = por %p3243_p12, %p3242_p5 }
  0x71   : > { %p3245_p6 = pnand %p3244_p1, %p3238_p7 }
  0x73   : > { %3248 = shalt.err (!%p3245_p6)
}
  0x74   : > { %s3249_s23 = scalar_lea.vmem %s3612_s13, 4096  ;;  %p5311_p3 = pmov %p5310_p8 }
  0x75   : > { %p3250_p10 = scmp.ne.s32.totalorder %s3612_s13, %s3249_s23  ;;  %s3411_s22 = smov [#allocation7]  }
  0x76   : > { %s3254_s21 = sshll.u32 %s3411_s22, 4  ;;  %s3255_s21 = int_to_ptr.vmem [resolvable:$false] %s3254_s21 }
  0x77   : > { %p3252_p4 = pnand %p3250_p10, %p5311_p3  ;;  %s3256_s8 = scalar_lea.vmem %s3255_s21, 8192 }
  0x78   : > { %p3257_p8 = scmp.lt.s32.totalorder %s3612_s13, %s3255_s21  ;;  %p3258_p13 = scmp.lt.s32.totalorder %s3256_s8, %s3249_s23 }
  0x79   : > { %p3253_p9 = pneg %p3252_p4 }
  0x7a   : > { %p3259_p11 = por %p3258_p13, %p3257_p8 }
  0x7c   : > { %p3260_p2 = pnand %p3259_p11, %p3253_p9 }
  0x7e   : > { %3263 = shalt.err (!%p3260_p2)
}
  0x7f   : > { %s5312_s16 = smov 8   ;;  %s5313_s15 = smov 128  }
  0x80   : > { %3077 = dma.hbm_to_vmem [thread:$0]  (!%p5309_p0), %s3638_s11, 4096, %s3612_s13, %s3583_s10, %s5313_s15, %s5313_s15, %s5312_s16  }
  0x81   : > { %p5314_p7 = scmp.ne.s32.totalorder %s5300_s9, 0 }
  0x83   : > { %310 = sbr.rel (%p5314_p7) target bundleno = 1024 (0x400), region = 40 }
  0x8a   : > { %s312_s12 = sand.u32 1, %s3482_s28   ;;  %s3671_s18 = sand.u32 1, %s3394_s25  }
  0x8b   : > { %s3674_s14 = sshll.u32 %s3671_s18, 3  ;;  %s313_s17 = scalar_lea.sflag [#allocation3], %s312_s12 }
  0x8c   : > { %s316_s0 = scalar_lea.vmem [#allocation2], %s3674_s14  ;;  %p5315_p5 = scmp.ne.s32.totalorder %s5297_s30, 0 }
  0x8e   : > { %3365 = dma.done.wait (%p5315_p5), %s313_s17, 128  }
  0x8f   : > { %3367 = vsyncadd (%p5315_p5), %s313_s17, 4294967168  ;;  %p5316_p0 = scmp.eq.s32.totalorder %s3482_s28, 0 }
  0x91   : > { %3369 = dma.done.wait (%p5316_p0), [#allocation6], 512   ;;  %p5317_p12 = pmov %p5316_p0 }
  0x92   : > { %s2680_s9 = sshll.u32 %s3671_s18, 8 }
  0x93   : > { %3371 = vsyncadd (%p5317_p12), [#allocation6], 4294966784  ;;  %s3690_s10 = scalar_lea.vmem [#allocation7], %s2680_s9 }
  0x94   : > { %3373 = dma.done.wait (%p5315_p5), %s313_s17, 4096  }
  0x95   : > { %3375 = vsyncadd (%p5315_p5), %s313_s17, 4294963200  ;;  %p5318_p1 = pmov %p5316_p0 }
  0x96   : > { %p5319_p6 = pmov %p5316_p0 }
  0x97   : > { %3377 = dma.done.wait (%p5318_p1), [#allocation6], 4096  }
  0x98   : > { %3379 = vsyncadd (%p5319_p6), [#allocation6], 4294963200  ;;  %v5208_v0 = vmov 0.0|0.0   ;;  %vm3413_vm0 = vmmov 0   ;;  %v5210_v1 = vmov 0.0   ;;  %v414_v2 = vld [vmem:[#allocation5] sm:$0xff] }
  0x99   : > { %2796 = vmatprep.subr.bf16.mxu0 %v5208_v0  ;;  %2738 = vmatprep.mubr.msk.f32.mxu0 %vm3413_vm0, %v5210_v1  ;;  %v415_v3 = vld [vmem:[#allocation5 + $0x8] sm:$0xff]  ;;  %v416_v4 = vld [vmem:[#allocation5 + $0x10] sm:$0xff]  ;;  %v419_v5 = vand.u32 4294901760, %v414_v2  ;;  %v417_v7 = vld [vmem:[#allocation5 + $0x18] sm:$0xff]  ;;  %vm903_vm1 = vcmask 261120   ;;  %s364_s11 = scalar_lea.vmem [#allocation9], %s3674_s14 }
  0x9a   : > { %1572 = vmatprep.mubr.f32.mxu1 %v5210_v1  ;;  %v422_v6 = vand.u32 4294901760, %v415_v3  ;;  %v425_v8 = vand.u32 4294901760, %v416_v4  ;;  %v381_v9 = vld [vmem:[%s316_s0] sm:$0xff]  ;;  %v3704_v10 = vld [vmem:[#allocation8 + $0x8] sm:$0xff]  ;;  %v428_v11 = vand.u32 4294901760, %v417_v7  ;;  %v3752_v33 = vld [vmem:[#allocation8] sm:$0xff] }
  0x9b   : > { %v3706_v12 = vand.u32 4294901760, %v381_v9  ;;  %v3708_v13 = vld [vmem:[#allocation8 + $0x18] sm:$0xff]  ;;  %v5196_v14 = vand.u32 4294901760, %v3704_v10  ;;  %v3713_v16 = vsub.f32 %v414_v2, %v419_v5  ;;  %v3762_v38 = vld [vmem:[#allocation8 + $0x10] sm:$0xff]  ;;  %v3764_v39 = vld [vmem:[#allocation8 + $0x28] sm:$0xff]  ;;  %v5191_v48 = vand.u32 4294901760, %v3752_v33 }
  0x9c   : > { %v3711_v15 = vpack.c.bf16 %v422_v6, %v419_v5  ;;  %v3715_v17 = vsub.f32 %v415_v3, %v422_v6  ;;  %v3717_v18 = vsub.f32 %v416_v4, %v425_v8  ;;  %v3719_v19 = vsub.f32 %v417_v7, %v428_v11  ;;  %v3771_v44 = vld [vmem:[#allocation8 + $0x38] sm:$0xff]  ;;  %v3779_v49 = vld [vmem:[#allocation8 + $0x20] sm:$0xff]  ;;  %v3784_v54 = vld [vmem:[#allocation8 + $0x30] sm:$0xff]  ;;  %s2689_s29 = sshll.u32 %s3482_s28, 7  ;;  %s2466_s8 = sshll.u32 %s364_s11, 4  ;;  %s2467_s8 = int_to_ptr.vmem [resolvable:$true] %s2466_s8 }
  0x9d   : > { %v3722_v20 = vsub.f32 %v381_v9, %v3706_v12  ;;  %v5207_v21 = vand.u32 4294901760, %v3713_v16  ;;  %v5193_v24 = vand.u32 4294901760, %v3708_v13  ;;  %v3730_v25 = vpack.c.bf16 %v428_v11, %v425_v8  ;;  %5321 = vst [vmem:[#allocation22_spill] sm:$0xff] %v3779_v49  ;;  %5322 = vst [vmem:[#allocation23_spill] sm:$0xff] %v3784_v54  ;;  %v3786_v55 = vld [vmem:[#allocation8 + $0x48] sm:$0xff]  ;;  %v3811_v2 = vld [vmem:[#allocation8 + $0x58] sm:$0xff]  ;;  %s4791_s21 = scalar_lea.hbm %s5156_s5, %s2689_s29 }
  0x9e   : > { %2798 = vmatpush3.bf16.xpose.msra.mxu0 %v3711_v15  ;;  %v5200_v22 = vand.u32 4294901760, %v3715_v17  ;;  %v5199_v23 = vand.u32 4294901760, %v3717_v18  ;;  %v5197_v27 = vand.u32 4294901760, %v3719_v19  ;;  %v3739_v28 = vsub.f32 %v3704_v10, %v5196_v14  ;;  %5323 = vst [vmem:[#allocation24_spill] sm:$0xff] %v3786_v55  ;;  %5324 = vst [vmem:[#allocation25_spill] sm:$0xff] %v3811_v2  ;;  %s2443_s16 = scalar_lea.sflag [#allocation4], %s3671_s18 }
  0x9f   : > { %2799 = vmatprep.subr.bf16.mxu0 %v5208_v0  ;;  %v3733_v26 = vand.u32 4294901760, %v3722_v20  ;;  %v501_v29 = vsub.f32 %v3713_v16, %v5207_v21  ;;  %v3769_v43 = vsub.f32 %v3708_v13, %v5193_v24  ;;  %v5190_v52 = vand.u32 4294901760, %v3762_v38  ;;  %s3264_s15 = scalar_lea.vmem %s2467_s8, 128  ;;  %p5482_p3 = scmp.ne.s32.totalorder %s5304_s20, 0 }
  0xa0   : > { %v508_v30 = vsub.f32 %v3715_v17, %v5200_v22  ;;  %v515_v31 = vsub.f32 %v3717_v18, %v5199_v23  ;;  %v522_v35 = vsub.f32 %v3719_v19, %v5197_v27  ;;  %v5178_v37 = vand.u32 4294901760, %v3739_v28  ;;  %p3265_p10 = scmp.ne.s32.totalorder %s2467_s8, %s3264_s15  ;;  %s3416_s17 = smov [#allocation9]  }
  0xa1   : > { %v490_v34 = vsub.f32 %v3722_v20, %v3733_v26  ;;  %v502_v40 = vand.u32 4294901760, %v501_v29  ;;  %v5177_v51 = vand.u32 4294901760, %v3769_v43  ;;  %v5186_v53 = vand.u32 4294901760, %v3764_v39  ;;  %s3268_s0 = sshll.u32 %s3416_s17, 4  ;;  %s3269_s0 = int_to_ptr.vmem [resolvable:$false] %s3268_s0 }
  0xa2   : > { %v509_v41 = vand.u32 4294901760, %v508_v30  ;;  %v516_v42 = vand.u32 4294901760, %v515_v31  ;;  %v523_v46 = vand.u32 4294901760, %v522_v35  ;;  %v1351_v47 = vsub.f32 %v3739_v28, %v5178_v37  ;;  %p3266_p4 = pnand %p3265_p10, %p5482_p3  ;;  %p3271_p8 = scmp.lt.s32.totalorder %s2467_s8, %s3269_s0 }
  0xa3   : > { %v3773_v45 = vand.u32 4294901760, %v490_v34  ;;  %v3793_v58 = vsub.f32 %v3752_v33, %v5191_v48  ;;  %v5185_v59 = vand.u32 4294901760, %v3771_v44  ;;  %v1363_v60 = vsub.f32 %v3769_v43, %v5177_v51 }
  0xa4   : > { %v2803_v50 = vpack.c.bf16 %v509_v41, %v502_v40  ;;  %v3788_v56 = vpack.c.bf16 %v523_v46, %v516_v42  ;;  %v1352_v57 = vand.u32 4294901760, %v1351_v47  ;;  %v3803_v61 = vsub.f32 %v3762_v38, %v5190_v52  ;;  %v3846_v46 = vld [vmem:[#allocation8 + $0x40] sm:$0xff]  ;;  %p3267_p9 = pneg %p3266_p4 }
  0xa5   : > { %5320 = vst [vmem:[#allocation21_spill] sm:$0xff] %v3773_v45  ;;  %v3808_v62 = vsub.f32 %v3764_v39, %v5186_v53  ;;  %v5183_v63 = vand.u32 4294901760, %v3779_v49  ;;  %v5173_v3 = vand.u32 4294901760, %v3793_v58  ;;  %v3818_v4 = vsub.f32 %v3771_v44, %v5185_v59  ;;  %5325 = vst [vmem:[#allocation26_spill] sm:$0xff] %v3846_v46 }
  0xa6   : > { %2801 = vmatpush3.bf16.xpose.msra.mxu0 %v3730_v25  ;;  %v5182_v5 = vand.u32 4294901760, %v3784_v54  ;;  %v5179_v6 = vand.u32 4294901760, %v3786_v55  ;;  %v1364_v7 = vand.u32 4294901760, %v1363_v60  ;;  %v5175_v8 = vand.u32 4294901760, %v3803_v61 }
  0xa7   : > { %2802 = vmatprep.subr.bf16.mxu0 %v5208_v0  ;;  %v5174_v9 = vand.u32 4294901760, %v3808_v62  ;;  %v3827_v11 = vsub.f32 %v3779_v49, %v5183_v63  ;;  %v1357_v29 = vsub.f32 %v3793_v58, %v5173_v3  ;;  %v5176_v30 = vand.u32 4294901760, %v3818_v4  ;;  %v3881_v63 = vld [vmem:[#allocation8 + $0x60] sm:$0xff] }
  0xa8   : > { %v3836_v31 = vsub.f32 %v3784_v54, %v5182_v5  ;;  %v5181_v34 = vand.u32 4294901760, %v3811_v2  ;;  %v2864_v35 = vpack.c.bf16 %v1364_v7, %v1352_v57  ;;  %v1369_v40 = vsub.f32 %v3803_v61, %v5175_v8  ;;  %v3857_v7 = vld [vmem:[#allocation8 + $0x50] sm:$0xff]  ;;  %5329 = vst [vmem:[#allocation30_spill] sm:$0xff] %v3881_v63 }
  0xa9   : > { %v1375_v41 = vsub.f32 %v3808_v62, %v5174_v9  ;;  %v5180_v42 = vand.u32 4294901760, %v3827_v11  ;;  %v1358_v47 = vand.u32 4294901760, %v1357_v29  ;;  %v1387_v60 = vsub.f32 %v3818_v4, %v5176_v30  ;;  %5326 = vst [vmem:[#allocation27_spill] sm:$0xff] %v3857_v7 }
  0xaa   : > { %v5184_v3 = vand.u32 4294901760, %v3836_v31  ;;  %v3855_v57 = vsub.f32 %v3786_v55, %v5179_v6  ;;  %2865 = vmatprep.subr.bf16.mxu1 %v2864_v35  ;;  %v1370_v9 = vand.u32 4294901760, %v1369_v40  ;;  %v3865_v30 = vsub.f32 %v3811_v2, %v5181_v34  ;;  %v3875_v6 = vld [vmem:[#allocation8 + $0x78] sm:$0xff] }
  0xab   : > { %v1376_v8 = vand.u32 4294901760, %v1375_v41  ;;  %v1381_v29 = vsub.f32 %v3827_v11, %v5180_v42  ;;  %v1388_v51 = vand.u32 4294901760, %v1387_v60  ;;  %v5188_v40 = vand.u32 4294901760, %v3846_v46  ;;  %v3873_v41 = vld [vmem:[#allocation8 + $0x68] sm:$0xff]  ;;  %5328 = vst [vmem:[#allocation29_spill] sm:$0xff] %v3875_v6 }
  0xac   : > { %v1393_v37 = vsub.f32 %v3836_v31, %v5184_v3  ;;  %v5187_v35 = vand.u32 4294901760, %v3855_v57  ;;  %5327 = vst [vmem:[#allocation28_spill] sm:$0xff] %v3873_v41  ;;  %v2866_v42 = vpack.c.bf16 %v1370_v9, %v1358_v47  ;;  %v5189_v60 = vand.u32 4294901760, %v3865_v30 }
  0xad   : > { %2739 = vmatmul.mubr.f32.vlgmr.msra.gmra.mrb[0].mxu0 %v3773_v45  ;;  %v1382_v34 = vand.u32 4294901760, %v1381_v29  ;;  %v5192_v5 = vand.u32 4294901760, %v3857_v7  ;;  %v2868_v3 = vpack.c.bf16 %v1388_v51, %v1376_v8  ;;  %v5195_v51 = vand.u32 4294901760, %v3875_v6  ;;  %v3902_v8 = vld [vmem:[#allocation8 + $0x70] sm:$0xff]  ;;  %v3904_v29 = vld [vmem:[#allocation8 + $0x88] sm:$0xff] }
  0xae   : > { %2804 = vmatpush3.bf16.xpose.msra.mxu0 %v2803_v50  ;;  %2749 = vmatprep.mubr.msk.f32.mxu0 %vm3413_vm0, %v5210_v1  ;;  %v1394_v59 = vand.u32 4294901760, %v1393_v37  ;;  %v1399_v53 = vsub.f32 %v3855_v57, %v5187_v35  ;;  %v3890_v50 = vsub.f32 %v3846_v46, %v5188_v40  ;;  %v1411_v9 = vsub.f32 %v3865_v30, %v5189_v60  ;;  %v3973_v1 = vld [vmem:[#allocation8 + $0xb8] sm:$0xff] }
  0xaf   : > { %2805 = vmatprep.subr.bf16.mxu0 %v5208_v0  ;;  %2867 = vmatpush1.bf16.msra.mxu1 %v2866_v42  ;;  %v3898_v47 = vsub.f32 %v3857_v7, %v5192_v5  ;;  %v5194_v37 = vand.u32 4294901760, %v3873_v41  ;;  %5330 = vst [vmem:[#allocation31_spill] sm:$0xff] %v3902_v8  ;;  %5331 = vst [vmem:[#allocation32_spill] sm:$0xff] %v3904_v29  ;;  %v5201_v60 = vand.u32 4294901760, %v3881_v63 }
  0xb0   : > { %2869 = vmatprep.subr.bf16.mxu1 %v2868_v3  ;;  %v2870_v35 = vpack.c.bf16 %v1394_v59, %v1382_v34  ;;  %v1400_v42 = vand.u32 4294901760, %v1399_v53  ;;  %v5198_v40 = vand.u32 4294901760, %v3890_v50  ;;  %v1412_v52 = vand.u32 4294901760, %v1411_v9  ;;  %v3919_v3 = vld [vmem:[#allocation8 + $0x98] sm:$0xff]  ;;  %5336 = vst [vmem:[#allocation37_spill] sm:$0xff] %v3973_v1 }
  0xb1   : > { %v5202_v48 = vand.u32 4294901760, %v3898_v47  ;;  %v3912_v5 = vsub.f32 %v3873_v41, %v5194_v37  ;;  %v3917_v24 = vsub.f32 %v3875_v6, %v5195_v51  ;;  %5332 = vst [vmem:[#allocation33_spill] sm:$0xff] %v3919_v3  ;;  %v5203_v59 = vand.u32 4294901760, %v3902_v8 }
  0xb2   : > { %v1405_v53 = vsub.f32 %v3890_v50, %v5198_v40  ;;  %v3928_v34 = vsub.f32 %v3881_v63, %v5201_v60  ;;  %v5206_v9 = vand.u32 4294901760, %v3904_v29  ;;  %v2872_v37 = vpack.c.bf16 %v1412_v52, %v1400_v42  ;;  %v3936_v40 = vld [vmem:[#allocation8 + $0x80] sm:$0xff] }
  0xb3   : > { %2871 = vmatpush1.bf16.msra.mxu1 %v2870_v35  ;;  %v1417_v51 = vsub.f32 %v3898_v47, %v5202_v48  ;;  %v5205_v14 = vand.u32 4294901760, %v3912_v5  ;;  %v5204_v27 = vand.u32 4294901760, %v3917_v24  ;;  %5333 = vst [vmem:[#allocation34_spill] sm:$0xff] %v3936_v40  ;;  %v3942_v60 = vsub.f32 %v3902_v8, %v5203_v59  ;;  %v3957_v59 = vld [vmem:[#allocation8 + $0x90] sm:$0xff] }
  0xb4   : > { %v1406_v23 = vand.u32 4294901760, %v1405_v53  ;;  %v5212_v22 = vand.u32 4294901760, %v3928_v34  ;;  %v5214_v52 = vand.u32 4294901760, %v3919_v3  ;;  %2873 = vmatprep.subr.bf16.mxu1 %v2872_v37  ;;  %v3955_v48 = vsub.f32 %v3904_v29, %v5206_v9  ;;  %5334 = vst [vmem:[#allocation35_spill] sm:$0xff] %v3957_v59 }
  0xb5   : > { %v1418_v35 = vand.u32 4294901760, %v1417_v51  ;;  %v1423_v42 = vsub.f32 %v3912_v5, %v5205_v14  ;;  %v1435_v53 = vsub.f32 %v3917_v24, %v5204_v27  ;;  %v5216_v37 = vand.u32 4294901760, %v3942_v60  ;;  %v3970_v14 = vld [vmem:[#allocation8 + $0xa8] sm:$0xff] }
  0xb6   : > { %2807 = vmatpush3.bf16.xpose.msra.mxu0 %v3788_v56  ;;  %v1429_v56 = vsub.f32 %v3928_v34, %v5212_v22  ;;  %v3967_v51 = vsub.f32 %v3919_v3, %v5214_v52  ;;  %5335 = vst [vmem:[#allocation36_spill] sm:$0xff] %v3970_v14  ;;  %v5220_v52 = vand.u32 4294901760, %v3957_v59  ;;  %v3980_v3 = vld [vmem:[#allocation8 + $0xa0] sm:$0xff] }
  0xb7   : > { %2808 = vmatprep.subr.bf16.mxu0 %v5208_v0  ;;  %v2874_v9 = vpack.c.bf16 %v1418_v35, %v1406_v23  ;;  %v1424_v21 = vand.u32 4294901760, %v1423_v42  ;;  %v1436_v36 = vand.u32 4294901760, %v1435_v53  ;;  %v5217_v0 = vand.u32 4294901760, %v3955_v48  ;;  %5337 = vst [vmem:[#allocation38_spill] sm:$0xff] %v3980_v3 }
  0xb8   : > { %v1430_v32 = vand.u32 4294901760, %v1429_v56  ;;  %v1441_v22 = vsub.f32 %v3942_v60, %v5216_v37  ;;  %v5218_v45 = vand.u32 4294901760, %v3967_v51  ;;  %v5338_v35 = vand.u32 4294901760, %v3936_v40 }
  0xb9   : > { %2875 = vmatpush1.bf16.msra.mxu1 %v2874_v9  ;;  %v2876_v27 = vpack.c.bf16 %v1436_v36, %v1424_v21  ;;  %v1447_v23 = vsub.f32 %v3955_v48, %v5217_v0  ;;  %v5222_v53 = vand.u32 4294901760, %v3970_v14  ;;  %v3997_v21 = vsub.f32 %v3957_v59, %v5220_v52  ;;  %v4000_v9 = vld [vmem:[#allocation8 + $0xb0] sm:$0xff]  ;;  %v4033_v36 = vld [vmem:[#allocation8 + $0xd8] sm:$0xff] }
  0xba   : > { %v3988_v42 = vsub.f32 %v3936_v40, %v5338_v35  ;;  %v1442_v56 = vand.u32 4294901760, %v1441_v22  ;;  %v1459_v37 = vsub.f32 %v3967_v51, %v5218_v45  ;;  %5339 = vst [vmem:[#allocation39_spill] sm:$0xff] %v4000_v9  ;;  %v4009_v40 = vld [vmem:[#allocation8 + $0xc8] sm:$0xff]  ;;  %v5342_v35 = vpack.c.bf16 %v3715_v17, %v3713_v16  ;;  %5346 = vst [vmem:[#allocation41_spill] sm:$0xff] %v4033_v36 }
  0xbb   : > { %2877 = vmatprep.subr.bf16.mxu1 %v2876_v27  ;;  %v1448_v0 = vand.u32 4294901760, %v1447_v23  ;;  %v4006_v22 = vsub.f32 %v3970_v14, %v5222_v53  ;;  %5340 = vst [vmem:[#allocation40_spill] sm:$0xff] %v4009_v40  ;;  %v5341_v27 = vand.u32 4294901760, %v3973_v1  ;;  %v5343_v53 = vmov 0.0  }
  0xbc   : > { %v2878_v52 = vpack.c.bf16 %v1442_v56, %v1430_v32  ;;  %v1460_v59 = vand.u32 4294901760, %v1459_v37  ;;  %v5344_v45 = vand.u32 4294901760, %v3988_v42  ;;  %v5345_v56 = vand.u32 4294901760, %v3980_v3  ;;  %v4041_v37 = vld [vmem:[#allocation8 + $0xc0] sm:$0xff] }
  0xbd   : > { %2750 = vmatmul.mubr.f32.vlgmr.msra.gmra.mrb[0].mxu0 %v3706_v12  ;;  %v4016_v23 = vsub.f32 %v3973_v1, %v5341_v27  ;;  %v5347_v1 = vmov 0.0|0.0   ;;  %v5348_v29 = vand.u32 4294901760, %v3997_v21  ;;  %5349 = vst [vmem:[#allocation42_spill] sm:$0xff] %v4041_v37  ;;  %v5358_v55 = vand.u32 4294901760, %v4041_v37 }
  0xbe   : > { %2810 = vmatpush3.bf16.xpose.msra.mxu0 %v5342_v35  ;;  %2760 = vmatprep.mubr.msk.f32.mxu0 %vm3413_vm0, %v5343_v53  ;;  %v1453_v14 = vsub.f32 %v3988_v42, %v5344_v45  ;;  %v4031_v27 = vsub.f32 %v3980_v3, %v5345_v56  ;;  %v2880_v35 = vpack.c.bf16 %v1460_v59, %v1448_v0  ;;  %v5350_v56 = vand.u32 4294901760, %v4006_v22 }
  0xbf   : > { %2811 = vmatprep.subr.bf16.mxu0 %v5347_v1  ;;  %2879 = vmatpush1.bf16.msra.mxu1 %v2878_v52  ;;  %v1465_v8 = vsub.f32 %v3997_v21, %v5348_v29  ;;  %v5233_v45 = vand.u32 4294901760, %v4016_v23  ;;  %v5351_v52 = vand.u32 4294901760, %v4000_v9 }
  0xc0   : > { %v1454_v63 = vand.u32 4294901760, %v1453_v14  ;;  %v1471_v3 = vsub.f32 %v4006_v22, %v5350_v56  ;;  %2881 = vmatprep.subr.bf16.mxu1 %v2880_v35  ;;  %v5352_v14 = vand.u32 4294901760, %v4009_v40  ;;  %v4061_v56 = vld [vmem:[#allocation8 + $0xd0] sm:$0xff]  ;;  %v5354_v7 = vand.u32 4294901760, %v4031_v27 }
  0xc1   : > { %v4050_v0 = vsub.f32 %v4000_v9, %v5351_v52  ;;  %v1466_v29 = vand.u32 4294901760, %v1465_v8  ;;  %v1483_v59 = vsub.f32 %v4016_v23, %v5233_v45  ;;  %5353 = vst [vmem:[#allocation43_spill] sm:$0xff] %v4061_v56  ;;  %v4068_v9 = vld [vmem:[#allocation8 + $0xe8] sm:$0xff] }
  0xc2   : > { %v4059_v41 = vsub.f32 %v4009_v40, %v5352_v14  ;;  %v1472_v6 = vand.u32 4294901760, %v1471_v3  ;;  %v1477_v52 = vsub.f32 %v4031_v27, %v5354_v7  ;;  %5355 = vst [vmem:[#allocation44_spill] sm:$0xff] %v4068_v9  ;;  %v5356_v14 = vand.u32 4294901760, %v4033_v36  ;;  %v4076_v3 = vld [vmem:[#allocation8 + $0xf8] sm:$0xff] }
  0xc3   : > { %v5239_v8 = vand.u32 4294901760, %v4050_v0  ;;  %v2882_v45 = vpack.c.bf16 %v1466_v29, %v1454_v63  ;;  %v1484_v32 = vand.u32 4294901760, %v1483_v59  ;;  %5357 = vst [vmem:[#allocation45_spill] sm:$0xff] %v4076_v3  ;;  %v4085_v63 = vsub.f32 %v4041_v37, %v5358_v55  ;;  %v4087_v29 = vld [vmem:[#allocation8 + $0xe0] sm:$0xff] }
  0xc4   : > { %v5241_v46 = vand.u32 4294901760, %v4059_v41  ;;  %v4074_v40 = vsub.f32 %v4033_v36, %v5356_v14  ;;  %v1478_v2 = vand.u32 4294901760, %v1477_v52  ;;  %v5246_v36 = vand.u32 4294901760, %v4068_v9 }
  0xc5   : > { %v1489_v7 = vsub.f32 %v4050_v0, %v5239_v8  ;;  %2883 = vmatpush1.bf16.msra.mxu1 %v2882_v45  ;;  %v2884_v59 = vpack.c.bf16 %v1484_v32, %v1472_v6  ;;  %v5359_v8 = vpack.c.bf16 %v3719_v19, %v3717_v18  ;;  %v5360_v37 = vand.u32 4294901760, %v4061_v56  ;;  %v4104_v32 = vld [vmem:[#allocation8 + $0xf0] sm:$0xff] }
  0xc6   : > { %v1495_v14 = vsub.f32 %v4059_v41, %v5241_v46  ;;  %v5244_v52 = vand.u32 4294901760, %v4074_v40  ;;  %5361 = vst [vmem:[#allocation46_spill] sm:$0xff] %v4104_v32  ;;  %v5362_v6 = vand.u32 4294901760, %v4085_v63 }
  0xc7   : > { %2813 = vmatpush3.bf16.xpose.msra.mxu0 %v5359_v8  ;;  %v1490_v35 = vand.u32 4294901760, %v1489_v7  ;;  %v4101_v45 = vsub.f32 %v4061_v56, %v5360_v37  ;;  %2885 = vmatprep.subr.bf16.mxu1 %v2884_v59  ;;  %v4113_v7 = vsub.f32 %v4068_v9, %v5246_v36  ;;  %v5249_v37 = vand.u32 4294901760, %v4087_v29 }
  0xc8   : > { %2814 = vmatprep.subr.bf16.mxu0 %v5347_v1  ;;  %v1496_v46 = vand.u32 4294901760, %v1495_v14  ;;  %v1507_v8 = vsub.f32 %v4074_v40, %v5244_v52  ;;  %v1501_v56 = vsub.f32 %v4085_v63, %v5362_v6  ;;  %v5363_v59 = vand.u32 4294901760, %v4076_v3 }
  0xc9   : > { %v2886_v55 = vpack.c.bf16 %v1490_v35, %v1478_v2  ;;  %v5252_v54 = vand.u32 4294901760, %v4101_v45  ;;  %v5250_v49 = vand.u32 4294901760, %v4113_v7  ;;  %v4130_v2 = vsub.f32 %v4087_v29, %v5249_v37 }
  0xca   : > { %v4123_v14 = vsub.f32 %v4076_v3, %v5363_v59  ;;  %v1508_v52 = vand.u32 4294901760, %v1507_v8  ;;  %v1502_v35 = vand.u32 4294901760, %v1501_v56  ;;  %v5364_v3 = vand.u32 4294901760, %v4104_v32 }
  0xcb   : > { %2887 = vmatpush1.bf16.msra.mxu1 %v2886_v55  ;;  %v1513_v6 = vsub.f32 %v4101_v45, %v5252_v54  ;;  %v1519_v8 = vsub.f32 %v4113_v7, %v5250_v49  ;;  %v5253_v36 = vand.u32 4294901760, %v4130_v2 }
  0xcc   : > { %v5251_v9 = vand.u32 4294901760, %v4123_v14  ;;  %v2888_v59 = vpack.c.bf16 %v1508_v52, %v1496_v46  ;;  %v4143_v37 = vsub.f32 %v4104_v32, %v5364_v3 }
  0xcd   : > { %v1514_v55 = vand.u32 4294901760, %v1513_v6  ;;  %v1520_v46 = vand.u32 4294901760, %v1519_v8  ;;  %v1525_v52 = vsub.f32 %v4130_v2, %v5253_v36  ;;  %v2896_v36 = vpack.c.bf16 %v3769_v43, %v3739_v28 }
  0xce   : > { %v1531_v56 = vsub.f32 %v4123_v14, %v5251_v9  ;;  %2761 = vmatmul.mubr.f32.vlgmr.msra.gmra.mrb[0].mxu0 %v3722_v20  ;;  %2889 = vmatprep.subr.bf16.mxu1 %v2888_v59  ;;  %v1536_v49 = vand.u32 4294901760, %v4143_v37 }
  0xcf   : > { %2816 = vmatpush3.bf16.xpose.msra.mxu0 %v3711_v15  ;;  %2771 = vmatprep.mubr.msk.f32.mxu0 %vm3413_vm0, %v5343_v53  ;;  %v2890_v3 = vpack.c.bf16 %v1514_v55, %v1502_v35  ;;  %v1526_v9 = vand.u32 4294901760, %v1525_v52  ;;  %v2898_v35 = vpack.c.bf16 %v3803_v61, %v3793_v58  ;;  %v2900_v55 = vpack.c.bf16 %v3818_v4, %v3808_v62 }
  0xd0   : > { %v1532_v6 = vand.u32 4294901760, %v1531_v56  ;;  %2817 = vmatprep.subr.bf16.mxu0 %v5347_v1  ;;  %v1537_v59 = vsub.f32 %v4143_v37, %v1536_v49  ;;  %v2902_v56 = vpack.c.bf16 %v3836_v31, %v3827_v11  ;;  %v2912_v52 = vpack.c.bf16 %v3967_v51, %v3955_v48 }
  0xd1   : > { %2891 = vmatpush1.bf16.msra.mxu1 %v2890_v3  ;;  %v5370_v3 = vand.u32 4294901760, %v3708_v13  ;;  %v5373_v13 = vand.u32 4294901760, %v3764_v39  ;;  %v2922_v39 = vpack.c.bf16 %v4101_v45, %v4085_v63 }
  0xd2   : > { %v2892_v8 = vpack.c.bf16 %v1532_v6, %v1520_v46  ;;  %v1538_v54 = vand.u32 4294901760, %v1537_v59  ;;  %v5367_v46 = vand.u32 4294901760, %v3717_v18  ;;  %v2906_v18 = vpack.c.bf16 %v3898_v47, %v3890_v50 }
  0xd3   : > { %v2916_v59 = vpack.c.bf16 %v4016_v23, %v4006_v22 }
  0xd4   : > { %2893 = vmatprep.subr.bf16.mxu1 %v2892_v8  ;;  %v2894_v32 = vpack.c.bf16 %v1538_v54, %v1526_v9  ;;  %v5365_v54 = vand.u32 4294901760, %v3713_v16  ;;  %v5366_v9 = vand.u32 4294901760, %v3715_v17  ;;  %v5368_v16 = vand.u32 4294901760, %v3719_v19 }
  0xd5   : > { %v2908_v19 = vpack.c.bf16 %v3917_v24, %v3912_v5  ;;  %v5371_v8 = vand.u32 4294901760, %v3752_v33  ;;  %v2920_v33 = vpack.c.bf16 %v4074_v40, %v4059_v41 }
  0xd6   : > { %2895 = vmatpush1.bf16.msra.mxu1 %v2894_v32  ;;  %v2821_v32 = vpack.c.bf16 %v5366_v9, %v5365_v54  ;;  %v2824_v17 = vpack.c.bf16 %v5368_v16, %v5367_v46  ;;  %v5379_v16 = vld [vmem:[#allocation24_spill] sm:$0xff] }
  0xd7   : > { %2819 = vmatpush3.bf16.xpose.msra.mxu0 %v3730_v25  ;;  %2897 = vmatprep.subr.bf16.mxu1 %v2896_v36  ;;  %v2904_v36 = vpack.c.bf16 %v3865_v30, %v3855_v57 }
  0xd8   : > { %2820 = vmatprep.subr.bf16.mxu0 %v5347_v1 }
  0xd9   : > { %1574 = vmatmul.mubr.f32.vlgmr.msra.gmra.mrb[0].mxu1 %v3706_v12 }
  0xda   : > { %2899 = vmatpush1.bf16.msra.mxu1 %v2898_v35  ;;  %1708 = vmatprep.mubr.f32.mxu1 %v5343_v53  ;;  %v5372_v35 = vand.u32 4294901760, %v3762_v38  ;;  %v5375_v38 = vld [vmem:[#allocation22_spill] sm:$0xff] }
  0xdb   : > { %2901 = vmatprep.subr.bf16.mxu1 %v2900_v55  ;;  %v5376_v9 = vand.u32 4294901760, %v5375_v38  ;;  %v5391_v38 = vld [vmem:[#allocation30_spill] sm:$0xff] }
  0xdc   : > { %v4217_v55 = vpack.c.bf16 %v5372_v35, %v5371_v8  ;;  %v5387_v8 = vld [vmem:[#allocation28_spill] sm:$0xff] }
  0xdd   : > { %v5388_v35 = vand.u32 4294901760, %v5387_v8 }
  0xde   : > { %2772 = vmatmul.mubr.f32.vlgmr.msra.gmra.mrb[0].mxu0 %v3733_v26  ;;  %2903 = vmatpush1.bf16.msra.mxu1 %v2902_v56  ;;  %v5374_v56 = vand.u32 4294901760, %v3771_v44  ;;  %v2924_v44 = vpack.c.bf16 %v4123_v14, %v4113_v7 }
  0xdf   : > { %2822 = vmatpush3.bf16.xpose.msra.mxu0 %v2821_v32  ;;  %2782 = vmatprep.mubr.msk.f32.mxu0 %vm3413_vm0, %v5343_v53  ;;  %v5377_v32 = vld [vmem:[#allocation23_spill] sm:$0xff] }
  0xe0   : > { %2823 = vmatprep.subr.bf16.mxu0 %v5347_v1  ;;  %2905 = vmatprep.subr.bf16.mxu1 %v2904_v36  ;;  %v4227_v54 = vpack.c.bf16 %v5374_v56, %v5373_v13  ;;  %v5378_v36 = vand.u32 4294901760, %v5377_v32  ;;  %v5389_v13 = vld [vmem:[#allocation29_spill] sm:$0xff]  ;;  %v5393_v32 = vld [vmem:[#allocation31_spill] sm:$0xff] }
  0xe1   : > { %v5390_v56 = vand.u32 4294901760, %v5389_v13 }
  0xe2   : > { %2907 = vmatpush1.bf16.msra.mxu1 %v2906_v18  ;;  %v4235_v46 = vpack.c.bf16 %v5378_v36, %v5376_v9  ;;  %v5381_v18 = vld [vmem:[#allocation25_spill] sm:$0xff]  ;;  %v5392_v9 = vand.u32 4294901760, %v5391_v38  ;;  %v5394_v36 = vand.u32 4294901760, %v5393_v32 }
  0xe3   : > { %2909 = vmatprep.subr.bf16.mxu1 %v2908_v19  ;;  %v5382_v19 = vand.u32 4294901760, %v5381_v18 }
  0xe7   : > { %2825 = vmatpush3.bf16.xpose.msra.mxu0 %v2824_v17  ;;  %v5380_v17 = vand.u32 4294901760, %v5379_v16  ;;  %v4270_v16 = vpack.c.bf16 %v5394_v36, %v5392_v9  ;;  %v5409_v36 = vld [vmem:[#allocation39_spill] sm:$0xff] }
  0xe8   : > { %2826 = vmatprep.subr.bf16.mxu0 %v5347_v1 }
  0xee   : > { %2783 = vmatmul.mubr.f32.vlgmr.msra.gmra.mrb[0].mxu0 %v3706_v12 }
  0xef   : > { %2828 = vmatpush3.bf16.xpose.msra.mxu0 %v3711_v15  ;;  %2793 = vmatprep.mubr.msk.f32.mxu0 %vm3413_vm0, %v5343_v53  ;;  %v2910_v15 = vpack.c.bf16 %v3942_v60, %v3928_v34 }
  0xf0   : > { %2829 = vmatprep.subr.bf16.mxu0 %v5347_v1  ;;  %v2914_v1 = vpack.c.bf16 %v3997_v21, %v3988_v42 }
  0xf1   : > { %2911 = vmatpush1.bf16.msra.mxu1 %v2910_v15  ;;  %v4241_v15 = vpack.c.bf16 %v5382_v19, %v5380_v17  ;;  %v5395_v17 = vld [vmem:[#allocation32_spill] sm:$0xff]  ;;  %v5397_v19 = vld [vmem:[#allocation33_spill] sm:$0xff] }
  0xf2   : > { %2913 = vmatprep.subr.bf16.mxu1 %v2912_v52  ;;  %v5383_v52 = vld [vmem:[#allocation26_spill] sm:$0xff]  ;;  %v5396_v18 = vand.u32 4294901760, %v5395_v17  ;;  %v5410_v17 = vand.u32 4294901760, %v5409_v36 }
  0xf5   : > { %2915 = vmatpush1.bf16.msra.mxu1 %v2914_v1  ;;  %v5384_v1 = vand.u32 4294901760, %v5383_v52  ;;  %v5398_v52 = vand.u32 4294901760, %v5397_v19 }
  0xf6   : > { %2917 = vmatprep.subr.bf16.mxu1 %v2916_v59 }
  0xf7   : > { %2831 = vmatpush3.bf16.xpose.msra.mxu0 %v3730_v25  ;;  %v5369_v25 = vand.u32 4294901760, %v3704_v10  ;;  %v2918_v10 = vpack.c.bf16 %v4050_v0, %v4031_v27 }
  0xf9   : > { %v4209_v6 = vpack.c.bf16 %v5370_v3, %v5369_v25  ;;  %2919 = vmatpush1.bf16.msra.mxu1 %v2918_v10  ;;  %v5385_v25 = vld [vmem:[#allocation27_spill] sm:$0xff]  ;;  %v4260_v10 = vpack.c.bf16 %v5390_v56, %v5388_v35  ;;  %v5403_v35 = vld [vmem:[#allocation36_spill] sm:$0xff]  ;;  %v5405_v56 = vld [vmem:[#allocation37_spill] sm:$0xff] }
  0xfa   : > { %2921 = vmatprep.subr.bf16.mxu1 %v2920_v33  ;;  %v5386_v3 = vand.u32 4294901760, %v5385_v25  ;;  %v2926_v33 = vpack.c.bf16 %v4143_v37, %v4130_v2  ;;  %v5401_v25 = vld [vmem:[#allocation35_spill] sm:$0xff]  ;;  %v5404_v13 = vand.u32 4294901760, %v5403_v35  ;;  %v5406_v38 = vand.u32 4294901760, %v5405_v56 }
  0xfb   : > { %2833 = vmatprep.subr.bf16.mxu0 %v4209_v6  ;;  %v5417_v35 = vld [vmem:[#allocation43_spill] sm:$0xff] }
  0xfc   : > { %v4254_v59 = vpack.c.bf16 %v5386_v3, %v5384_v1  ;;  %v4276_v1 = vpack.c.bf16 %v5398_v52, %v5396_v18  ;;  %v5402_v3 = vand.u32 4294901760, %v5401_v25  ;;  %v4292_v9 = vpack.c.bf16 %v5406_v38, %v5404_v13  ;;  %v5413_v52 = vld [vmem:[#allocation41_spill] sm:$0xff]  ;;  %v5415_v25 = vld [vmem:[#allocation42_spill] sm:$0xff]  ;;  %v5419_v38 = vld [vmem:[#allocation44_spill] sm:$0xff] }
  0xfd   : > { %2923 = vmatpush1.bf16.msra.mxu1 %v2922_v39  ;;  %v5399_v39 = vld [vmem:[#allocation34_spill] sm:$0xff]  ;;  %v5418_v13 = vand.u32 4294901760, %v5417_v35 }
  0xfe   : > { %2794 = vmatmul.mubr.f32.vlgmr.msra.gmra.mrb[0].mxu0 %v3706_v12  ;;  %2925 = vmatprep.subr.bf16.mxu1 %v2924_v44  ;;  %v5400_v44 = vand.u32 4294901760, %v5399_v39  ;;  %v5414_v39 = vand.u32 4294901760, %v5413_v52 }
  0xff   : > { %1336 = vmatprep.mubr.f32.mxu0 %v5343_v53  ;;  %2835 = vmatpush1.bf16.msra.mxu0 %v4217_v55 }
 0x100   : > { %2837 = vmatprep.subr.bf16.mxu0 %v4227_v54  ;;  %v4285_v8 = vpack.c.bf16 %v5402_v3, %v5400_v44  ;;  %v5416_v3 = vand.u32 4294901760, %v5415_v25  ;;  %v5426_v25 = vld [vmem:[#allocation21_spill] sm:$0xff] }
 0x101   : > { %2927 = vmatpush1.bf16.msra.mxu1 %v2926_v33  ;;  %v5407_v33 = vld [vmem:[#allocation38_spill] sm:$0xff] }
 0x102   : > { %2929 = vmatprep.subr.bf16.mxu1 %v4209_v6  ;;  %v5408_v32 = vand.u32 4294901760, %v5407_v33  ;;  %v4319_v56 = vpack.c.bf16 %v5418_v13, %v5416_v3  ;;  %v5420_v33 = vand.u32 4294901760, %v5419_v38  ;;  %v5428_v3 = vand.u32 4294901760, %v3769_v43 }
 0x103   : > { %2839 = vmatpush1.bf16.msra.mxu0 %v4235_v46  ;;  %v5429_v13 = vand.u32 4294901760, %v3793_v58  ;;  %v5430_v38 = vand.u32 4294901760, %v3803_v61  ;;  %v5434_v43 = vand.u32 4294901760, %v3836_v31  ;;  %v5435_v58 = vand.u32 4294901760, %v3855_v57 }
 0x104   : > { %2841 = vmatprep.subr.bf16.mxu0 %v4241_v15  ;;  %1711 = vmatmul.mubr.f32.vlgmr.msra.gmra.mrb[0].mxu1 %v3722_v20  ;;  %v4302_v18 = vpack.c.bf16 %v5410_v17, %v5408_v32  ;;  %v5411_v20 = vld [vmem:[#allocation40_spill] sm:$0xff]  ;;  %v5421_v32 = vld [vmem:[#allocation45_spill] sm:$0xff]  ;;  %v5436_v61 = vand.u32 4294901760, %v3865_v30  ;;  %v5440_v31 = vand.u32 4294901760, %v3917_v24  ;;  %v5442_v57 = vand.u32 4294901760, %v3942_v60 }
 0x105   : > { %2931 = vmatpush1.bf16.msra.mxu1 %v4217_v55  ;;  %1813 = vmatprep.mubr.f32.mxu1 %v5343_v53  ;;  %v5412_v19 = vand.u32 4294901760, %v5411_v20  ;;  %v5422_v36 = vand.u32 4294901760, %v5421_v32  ;;  %v5423_v20 = vand.u32 4294901760, %v4087_v29  ;;  %v5427_v29 = vand.u32 4294901760, %v3739_v28 }
 0x106   : > { %2933 = vmatprep.subr.bf16.mxu1 %v4227_v54  ;;  %v5431_v32 = vand.u32 4294901760, %v3808_v62  ;;  %v5433_v28 = vand.u32 4294901760, %v3827_v11  ;;  %v5437_v62 = vand.u32 4294901760, %v3890_v50  ;;  %v5439_v11 = vand.u32 4294901760, %v3912_v5 }
 0x107   : > { %2843 = vmatpush1.bf16.msra.mxu0 %v4254_v59  ;;  %v4309_v44 = vpack.c.bf16 %v5414_v39, %v5412_v19  ;;  %v4325_v17 = vpack.c.bf16 %v5422_v36, %v5420_v33  ;;  %v5424_v19 = vld [vmem:[#allocation46_spill] sm:$0xff]  ;;  %v2960_v35 = vpack.c.bf16 %v5428_v3, %v5427_v29  ;;  %v2962_v33 = vpack.c.bf16 %v5430_v38, %v5429_v13 }
 0x108   : > { %2845 = vmatprep.subr.bf16.mxu0 %v4260_v10  ;;  %v5425_v52 = vand.u32 4294901760, %v5424_v19  ;;  %v5432_v36 = vand.u32 4294901760, %v3818_v4  ;;  %v2966_v19 = vpack.c.bf16 %v5434_v43, %v5433_v28  ;;  %v5438_v4 = vand.u32 4294901760, %v3898_v47 }
 0x109   : > { %2935 = vmatpush1.bf16.msra.mxu1 %v4235_v46  ;;  %v5441_v29 = vand.u32 4294901760, %v3928_v34  ;;  %v5443_v30 = vand.u32 4294901760, %v3955_v48  ;;  %v5444_v50 = vand.u32 4294901760, %v3967_v51  ;;  %v5445_v47 = vand.u32 4294901760, %v3988_v42 }
 0x10a   : > { %2937 = vmatprep.subr.bf16.mxu1 %v4241_v15  ;;  %v2862_v39 = vpack.c.bf16 %v5425_v52, %v5423_v20  ;;  %v2964_v20 = vpack.c.bf16 %v5432_v36, %v5431_v32  ;;  %v2968_v52 = vpack.c.bf16 %v5436_v61, %v5435_v58  ;;  %v5446_v5 = vand.u32 4294901760, %v3997_v21 }
 0x10b   : > { %2847 = vmatpush1.bf16.msra.mxu0 %v4270_v16  ;;  %v2974_v3 = vpack.c.bf16 %v5442_v57, %v5441_v29  ;;  %v5447_v24 = vand.u32 4294901760, %v4006_v22  ;;  %v5448_v34 = vand.u32 4294901760, %v4016_v23  ;;  %v5449_v60 = vand.u32 4294901760, %v4031_v27 }
 0x10c   : > { %2849 = vmatprep.subr.bf16.mxu0 %v4276_v1  ;;  %v2978_v13 = vpack.c.bf16 %v5446_v5, %v5445_v47  ;;  %v5450_v48 = vand.u32 4294901760, %v4050_v0  ;;  %v5451_v51 = vand.u32 4294901760, %v4059_v41  ;;  %v5452_v42 = vand.u32 4294901760, %v4074_v40  ;;  %v4460_v5 = vld [vmem:[%s3690_s10 + $0x8] sm:$0xff] }
 0x10d   : > { %2939 = vmatpush1.bf16.msra.mxu1 %v4254_v59  ;;  %v2980_v38 = vpack.c.bf16 %v5448_v34, %v5447_v24  ;;  %v5453_v21 = vand.u32 4294901760, %v4085_v63  ;;  %v5454_v22 = vand.u32 4294901760, %v4101_v45  ;;  %v5455_v23 = vand.u32 4294901760, %v4113_v7 }
 0x10e   : > { %2941 = vmatprep.subr.bf16.mxu1 %v4260_v10  ;;  %v2984_v32 = vpack.c.bf16 %v5452_v42, %v5451_v51  ;;  %v5456_v27 = vand.u32 4294901760, %v4123_v14  ;;  %v5457_v0 = vand.u32 4294901760, %v4130_v2  ;;  %v915_v2 = vlaneseq  ;;  %v4473_v51 = vld [vmem:[%s3690_s10 + $0x20] sm:$0xff] }
 0x10f   : > { %2851 = vmatpush1.bf16.msra.mxu0 %v4285_v8  ;;  %v2986_v36 = vpack.c.bf16 %v5454_v22, %v5453_v21  ;;  %v4482_v21 = vld [vmem:[%s3690_s10 + $0x80] sm:$0xff] }
 0x110   : > { %2853 = vmatprep.subr.bf16.mxu0 %v4292_v9  ;;  %v2990_v41 = vpack.c.bf16 %v1536_v49, %v5457_v0 }
 0x111   : > { %2943 = vmatpush1.bf16.msra.mxu1 %v4270_v16 }
 0x112   : > { %2945 = vmatprep.subr.bf16.mxu1 %v4276_v1 }
 0x113   : > { %2855 = vmatpush1.bf16.msra.mxu0 %v4302_v18 }
 0x114   : > { %2857 = vmatprep.subr.bf16.mxu0 %v4309_v44 }
 0x115   : > { %2947 = vmatpush1.bf16.msra.mxu1 %v4285_v8 }
 0x116   : > { %2949 = vmatprep.subr.bf16.mxu1 %v4292_v9 }
 0x117   : > { %2859 = vmatpush1.bf16.msra.mxu0 %v4319_v56 }
 0x118   : > { %2861 = vmatprep.subr.bf16.mxu0 %v4325_v17 }
 0x119   : > { %2951 = vmatpush1.bf16.msra.mxu1 %v4302_v18 }
 0x11a   : > { %2953 = vmatprep.subr.bf16.mxu1 %v4309_v44 }
 0x11b   : > { %2863 = vmatpush1.bf16.msra.mxu0 %v2862_v39 }
 0x11d   : > { %2955 = vmatpush1.bf16.msra.mxu1 %v4319_v56 }
 0x11e   : > { %1342 = vmatmul.mubr.f32.vlgmr.msra.gmra.mrb[2].mxu0 %v5426_v25  ;;  %2957 = vmatprep.subr.bf16.mxu1 %v4325_v17  ;;  %v2972_v25 = vpack.c.bf16 %v5440_v31, %v5439_v11 }
 0x121   : > { %2959 = vmatpush1.bf16.msra.mxu1 %v2862_v39 }
 0x122   : > { %2961 = vmatprep.subr.bf16.mxu1 %v2960_v35  ;;  %v2976_v35 = vpack.c.bf16 %v5444_v50, %v5443_v30 }
 0x124   : > { %1817 = vmatmul.mubr.f32.vlgmr.msra.gmra.mrb[0].mxu1 %v3733_v26  ;;  %v2970_v26 = vpack.c.bf16 %v5438_v4, %v5437_v62 }
 0x125   : > { %2963 = vmatpush1.bf16.msra.mxu1 %v2962_v33  ;;  %1983 = vmatprep.mubr.f32.mxu1 %v5343_v53  ;;  %v2982_v33 = vpack.c.bf16 %v5450_v48, %v5449_v60 }
 0x126   : > { %2965 = vmatprep.subr.bf16.mxu1 %v2964_v20  ;;  %v2988_v20 = vpack.c.bf16 %v5456_v27, %v5455_v23  ;;  %v4490_v23 = vld [vmem:[%s3690_s10 + $0x28] sm:$0xff] }
 0x129   : > { %2967 = vmatpush1.bf16.msra.mxu1 %v2966_v19 }
 0x12a   : > { %2969 = vmatprep.subr.bf16.mxu1 %v2968_v52 }
 0x12d   : > { %2971 = vmatpush1.bf16.msra.mxu1 %v2970_v26 }
 0x12e   : > { %2973 = vmatprep.subr.bf16.mxu1 %v2972_v25 }
 0x131   : > { %2975 = vmatpush1.bf16.msra.mxu1 %v2974_v3 }
 0x132   : > { %2977 = vmatprep.subr.bf16.mxu1 %v2976_v35  ;;  %v4456_v35 = vld [vmem:[%s3690_s10] sm:$0xff] }
 0x135   : > { %2979 = vmatpush1.bf16.msra.mxu1 %v2978_v13 }
 0x136   : > { %2981 = vmatprep.subr.bf16.mxu1 %v2980_v38 }
 0x139   : > { %2983 = vmatpush1.bf16.msra.mxu1 %v2982_v33 }
 0x13a   : > { %2985 = vmatprep.subr.bf16.mxu1 %v2984_v32 }
 0x13d   : > { %2987 = vmatpush1.bf16.msra.mxu1 %v2986_v36 }
 0x13e   : > { %2989 = vmatprep.subr.bf16.mxu1 %v2988_v20 }
 0x141   : > { %2991 = vmatpush1.bf16.msra.mxu1 %v2990_v41 }
 0x142   : > { %2993 = vmatprep.subr.bf16.mxu1 %v4209_v6  ;;  %v4433_v6 = vshrl.u32 %v915_v2, 7 }
 0x144   : > { %1985 = vmatmul.mubr.f32.vlgmr.msra.gmra.mrb[0].mxu1 %v3706_v12 }
 0x145   : > { %2995 = vmatpush1.bf16.msra.mxu1 %v4217_v55  ;;  %2087 = vmatprep.mubr.f32.mxu1 %v5343_v53  ;;  %v1228_v55 = vld [vmem:[%s5155_s4] sm:$0x3] }
 0x146   : > { %2997 = vmatprep.subr.bf16.mxu1 %v4227_v54 }
 0x149   : > { %2999 = vmatpush1.bf16.msra.mxu1 %v4235_v46 }
 0x14a   : > { %3001 = vmatprep.subr.bf16.mxu1 %v4241_v15 }
 0x14d   : > { %3003 = vmatpush1.bf16.msra.mxu1 %v4254_v59 }
 0x14e   : > { %3005 = vmatprep.subr.bf16.mxu1 %v4260_v10 }
 0x151   : > { %3007 = vmatpush1.bf16.msra.mxu1 %v4270_v16 }
 0x152   : > { %3009 = vmatprep.subr.bf16.mxu1 %v4276_v1  ;;  %v5255_v1 = vsub.s32 1, %v4433_v6 }
 0x155   : > { %3011 = vmatpush1.bf16.msra.mxu1 %v4285_v8 }
 0x156   : > { %3013 = vmatprep.subr.bf16.mxu1 %v4292_v9  ;;  %v1237_v9 = vrot.slane %v1228_v55, %v5255_v1  ;;  %v4662_v1 = vld [vmem:[%s3690_s10 + $0xe8] sm:$0xff] }
 0x157   : > { %5470 = vst [vmem:[#allocation34_spill] sm:$0xff] %v4662_v1 }
 0x159   : > { %3015 = vmatpush1.bf16.msra.mxu1 %v4302_v18 }
 0x15a   : > { %3017 = vmatprep.subr.bf16.mxu1 %v4309_v44 }
 0x15d   : > { %3019 = vmatpush1.bf16.msra.mxu1 %v4319_v56 }
 0x15e   : > { %3021 = vmatprep.subr.bf16.mxu1 %v4325_v17  ;;  %v3415_v17 = vmov 1966171168  }
 0x161   : > { %3023 = vmatpush1.bf16.msra.mxu1 %v2862_v39  ;;  %v2105_v39 = vunpack.c.l.s4 %v3415_v17 }
 0x163   : > { %v2106_v19 = vunpack.c.0.s8 %v2105_v39 }
 0x164   : > { %2089 = vmatmul.mubr.f32.vlgmr.msra.gmra.mrb[0].mxu1 %v3706_v12  ;;  %v4436_v12 = vsub.s32 0, %v4433_v6 }
 0x165   : > { %v4446_v58 = vsub.s32 %v2106_v19, %v4433_v6 }
 0x166   : > { %v1233_v46 = vrot.slane %v1228_v55, %v4436_v12 }
 0x1d1   : > { %v899_v49 = vpop.f32.mrb[0].mxu0 }
 0x1d2   : > { %v2795_v40 = vpop.f32.mrb[1].mxu0  ;;  %v904_v53 = vsel %vm903_vm1, %v899_v49, -inf }
 0x1d3   : > { %905 = vmax.xlane.f32.xlu0 %v904_v53  ;;  %v4508_v53 = vld [vmem:[%s3690_s10 + $0x68] sm:$0xff]  ;;  %v4653_v40 = vld [vmem:[%s3690_s10 + $0x58] sm:$0xff] }
 0x1d4   : > { %5469 = vst [vmem:[#allocation33_spill] sm:$0xff] %v4653_v40 }
 0x1f1   : > { %v1343_v54 = vpop.f32.mrb[2].mxu0 }
 0x1f2   : > { %v1344_v15 = vadd.f32 %v1343_v54, %v1233_v46  ;;  %v1345_v18 = vpop.f32.mrb[3].mxu0 }
 0x1f3   : > { %v1346_v28 = vadd.f32 %v1345_v18, %v1237_v9  ;;  %v4548_v18 = vld [vmem:[%s3690_s10 + $0x10] sm:$0xff] }
 0x237   : > { %v2090_v59 = vpop.f32.mrb[0].mxu1 }
 0x238   : > { %v3025_v10 = vadd.f32 %v2090_v59, %v1344_v15  ;;  %v2092_v44 = vpop.f32.mrb[1].mxu1  ;;  %v4536_v15 = vld [vmem:[%s3690_s10 + $0x40] sm:$0xff]  ;;  %v4539_v59 = vld [vmem:[%s3690_s10 + $0x48] sm:$0xff] }
 0x239   : > { %v3027_v43 = vadd.f32 %v2092_v44, %v1346_v28  ;;  %v4559_v28 = vld [vmem:[%s3690_s10 + $0x90] sm:$0xff]  ;;  %v4647_v44 = vld [vmem:[%s3690_s10 + $0x38] sm:$0xff] }
 0x23a   : > { %v2685_v16 = vmul.f32 -1.442695, %v3025_v10  ;;  %5467 = vst [vmem:[#allocation31_spill] sm:$0xff] %v4647_v44 }
 0x260   : > { %v906_v63 = vpop.xlane.xlu0 %905 }
 0x261   : > { %v907_v45 = vsub.f32 %v899_v49, %v906_v63  ;;  %v4503_v49 = vld [vmem:[%s3690_s10 + $0x18] sm:$0xff] }
 0x263   : > { %v908_v7 = vmul.f32 1.442695, %v907_v45 }
 0x265   : > { %3138 = vpow2.f32 %v908_v7 }
 0x266   : > { %3140 = vpow2.f32 %v2685_v16 }
 0x26f   : > { %v4429_v37 = vpop.eup %3138 }
 0x270   : > { %v910_v14 = vsel %vm903_vm1, %v4429_v37, 0.0  ;;  %v3141_v8 = vpop.eup %3140 }
 0x271   : > { %911 = vadd.xlane.f32.xlu0 %v910_v14  ;;  %v2098_v56 = vadd.f32 1.0, %v3141_v8  ;;  %v4520_v14 = vld [vmem:[%s3690_s10 + $0x70] sm:$0xff] }
 0x273   : > { %3142 = vrcp.f32 %v2098_v56 }
 0x274   : > { %3144 = vtanh.f32 %v3027_v43  ;;  %v4562_v43 = vld [vmem:[%s3690_s10 + $0x30] sm:$0xff] }
 0x27d   : > { %v3143_v61 = vpop.eup %3142 }
 0x27e   : > { %v2153_v52 = vcombine.high %v3143_v61, %v3143_v61  ;;  %v2160_v62 = vrot.slane %v3143_v61, %v4446_v58  ;;  %v3145_v4 = vpop.eup %3144 }
 0x27f   : > { %v2103_v26 = vcombine.high %v3145_v4, %v3145_v4  ;;  %v2110_v11 = vrot.slane %v3145_v4, %v4446_v58  ;;  %v4623_v4 = vld [vmem:[%s3690_s10 + $0x88] sm:$0xff] }
 0x280   : > { %v2168_v31 = vcombine.high %v2160_v62, %v2160_v62  ;;  %v2176_v25 = vrot.slane %v2160_v62, %v4446_v58  ;;  %v2167_v29 = vrot.slane %v2153_v52, %v4446_v58  ;;  %5462 = vst [vmem:[#allocation26_spill] sm:$0xff] %v4623_v4 }
 0x281   : > { %v2117_v57 = vrot.slane %v2103_v26, %v4446_v58  ;;  %v2118_v3 = vcombine.high %v2110_v11, %v2110_v11  ;;  %v2126_v50 = vrot.slane %v2110_v11, %v4446_v58 }
 0x282   : > { %v2190_v30 = vrot.slane %v2168_v31, %v4446_v58  ;;  %v2205_v47 = vrot.slane %v2176_v25, %v4436_v12  ;;  %v4463_v13 = vrot.slane %v2167_v29, %v4446_v58  ;;  %v2198_v24 = vcombine.high %v2176_v25, %v2176_v25  ;;  %v4583_v25 = vld [vmem:[%s3690_s10 + $0x60] sm:$0xff] }
 0x283   : > { %v2169_v34 = vcombine.high %v2167_v29, %v2167_v29  ;;  %v2140_v38 = vrot.slane %v2118_v3, %v4446_v58  ;;  %v4470_v48 = vrot.slane %v2126_v50, %v4436_v12  ;;  %v2133_v22 = vrot.slane %v2117_v57, %v4446_v58  ;;  %5458 = vst [vmem:[#allocation22_spill] sm:$0xff] %v4583_v25  ;;  %v4590_v3 = vld [vmem:[%s3690_s10 + $0xa8] sm:$0xff]  ;;  %v4641_v29 = vld [vmem:[%s3690_s10 + $0xd0] sm:$0xff] }
 0x284   : > { %v4467_v60 = vrot.slane %v2190_v30, %v4436_v12  ;;  %v2200_v33 = vcombine.high %v2190_v30, %v2190_v30  ;;  %v4476_v42 = vmul.f32 %v2205_v47, %v4456_v35  ;;  %v4479_v32 = vmul.f32 %v2205_v47, %v4460_v5  ;;  %5466 = vst [vmem:[#allocation30_spill] sm:$0xff] %v4641_v29 }
 0x285   : > { %v4487_v36 = vrot.slane %v4463_v13, %v4436_v12  ;;  %v4497_v20 = vrot.slane %v2140_v38, %v4436_v12  ;;  %v2150_v0 = vcombine.high %v2140_v38, %v2140_v38  ;;  %v4517_v7 = vrot.slane %v2133_v22, %v4436_v12  ;;  %v4629_v38 = vld [vmem:[%s3690_s10 + $0xc8] sm:$0xff] }
 0x286   : > { %v4494_v27 = vmul.f32 %v4467_v60, %v4473_v51  ;;  %v4500_v41 = vrot.slane %v2200_v33, %v4436_v12  ;;  %v4533_v46 = vmul.f32 %v4467_v60, %v4490_v23  ;;  %v4544_v16 = vmul.f32 %v2205_v47, %v4503_v49  ;;  %5463 = vst [vmem:[#allocation27_spill] sm:$0xff] %v4629_v38 }
 0x287   : > { %v4514_v45 = vmul.f32 %v4487_v36, %v4482_v21  ;;  %v4529_v54 = vrot.slane %v2150_v0, %v4436_v12  ;;  %v2148_v8 = vcombine.high %v2126_v50, %v2126_v50  ;;  %v2213_v9 = vrot.slane %v2198_v24, %v4436_v12  ;;  %v4601_v50 = vld [vmem:[%s3690_s10 + $0xb0] sm:$0xff] }
 0x288   : > { %v4526_v55 = vmul.f32 %v4500_v41, %v4508_v53  ;;  %v4556_v17 = vmul.f32 %v4500_v41, %v4520_v14  ;;  %v2119_v39 = vcombine.high %v2117_v57, %v2117_v57  ;;  %v2197_v11 = vrot.slane %v2169_v34, %v4446_v58  ;;  %5459 = vst [vmem:[#allocation23_spill] sm:$0xff] %v4601_v50 }
 0x289   : > { %v4567_v61 = vmul.f32 %v2213_v9, %v4536_v15  ;;  %v4570_v52 = vrot.slane %v2148_v8, %v4436_v12  ;;  %v4573_v62 = vmul.f32 %v2213_v9, %v4539_v59  ;;  %v4580_v31 = vmul.f32 %v2205_v47, %v4548_v18  ;;  %v4604_v47 = vld [vmem:[%s3690_s10 + $0x50] sm:$0xff] }
 0x28a   : > { %v2147_v26 = vrot.slane %v2119_v39, %v4446_v58  ;;  %v4594_v30 = vmul.f32 %v4487_v36, %v4559_v28  ;;  %v4598_v58 = vmul.f32 %v4467_v60, %v4562_v43  ;;  %5460 = vst [vmem:[#allocation24_spill] sm:$0xff] %v4604_v47  ;;  %v2225_v24 = vrot.slane %v2197_v11, %v4436_v12 }
 0x28b   : > { %v2149_v33 = vcombine.high %v2133_v22, %v2133_v22  ;;  %v2199_v39 = vcombine.high %v4463_v13, %v4463_v13  ;;  %v4620_v57 = vmul.f32 %v4500_v41, %v4583_v25  ;;  %v4638_v13 = vmul.f32 %v2213_v9, %v4604_v47 }
 0x28c   : > { %v4608_v34 = vrot.slane %v2147_v26, %v4436_v12  ;;  %v4626_v22 = vmul.f32 %v2225_v24, %v4590_v3  ;;  %v4635_v8 = vmul.f32 %v2225_v24, %v4601_v50  ;;  %v2151_v10 = vcombine.high %v2147_v26, %v2147_v26  ;;  %v4682_v50 = vld [vmem:[%s3690_s10 + $0xf8] sm:$0xff] }
 0x28d   : > { %5461 = vst [vmem:[#allocation25_spill] sm:$0xff] %v4620_v57  ;;  %v4632_v0 = vrot.slane %v2149_v33, %v4436_v12  ;;  %5465 = vst [vmem:[#allocation29_spill] sm:$0xff] %v4638_v13  ;;  %v2229_v19 = vrot.slane %v2199_v39, %v4436_v12  ;;  %v2201_v63 = vcombine.high %v2197_v11, %v2197_v11  ;;  %v4650_v33 = vld [vmem:[%s3690_s10 + $0xa0] sm:$0xff]  ;;  %v4669_v11 = vld [vmem:[%s3690_s10 + $0xf0] sm:$0xff] }
 0x28e   : > { %5464 = vst [vmem:[#allocation28_spill] sm:$0xff] %v4635_v8  ;;  %5468 = vst [vmem:[#allocation32_spill] sm:$0xff] %v4650_v33  ;;  %v4666_v26 = vmul.f32 %v4487_v36, %v4623_v4  ;;  %v4676_v39 = vrot.slane %v2151_v10, %v4436_v12  ;;  %v4688_v13 = vmul.f32 %v4467_v60, %v4647_v44  ;;  %v4697_v10 = vld [vmem:[%s3690_s10 + $0xc0] sm:$0xff] }
 0x28f   : > { %5472 = vst [vmem:[#allocation36_spill] sm:$0xff] %v4669_v11  ;;  %v4672_v47 = vmul.f32 %v2229_v19, %v4629_v38  ;;  %v2233_v2 = vrot.slane %v2201_v63, %v4436_v12  ;;  %v4679_v56 = vmul.f32 %v2229_v19, %v4641_v29  ;;  %5474 = vst [vmem:[#allocation38_spill] sm:$0xff] %v4682_v50  ;;  %v4700_v29 = vld [vmem:[%s3690_s10 + $0x78] sm:$0xff] }
 0x290   : > { %5471 = vst [vmem:[#allocation35_spill] sm:$0xff] %v4666_v26  ;;  %v4691_v8 = vmul.f32 %v2225_v24, %v4650_v33  ;;  %v4694_v63 = vmul.f32 %v2213_v9, %v4653_v40  ;;  %v4713_v33 = vld [vmem:[%s3690_s10 + $0xe0] sm:$0xff]  ;;  %v4716_v9 = vld [vmem:[%s3690_s10 + $0x98] sm:$0xff]  ;;  %v4738_v57 = vmul.f32 %v2229_v19, %v4697_v10  ;;  %v4742_v25 = vmul.f32 %v4500_v41, %v4700_v29 }
 0x291   : > { %5473 = vst [vmem:[#allocation37_spill] sm:$0xff] %v4679_v56  ;;  %v4705_v4 = vmul.f32 %v2233_v2, %v4662_v1  ;;  %v4710_v44 = vmul.f32 %v2233_v2, %v4669_v11  ;;  %5475 = vst [vmem:[#allocation39_spill] sm:$0xff] %v4713_v33  ;;  %v4719_v40 = vld [vmem:[%s3690_s10 + $0xb8] sm:$0xff]  ;;  %v4726_v1 = vmul.f32 %v2233_v2, %v4682_v50 }
 0x292   : > { %5476 = vst [vmem:[#allocation40_spill] sm:$0xff] %v4716_v9  ;;  %5477 = vst [vmem:[#allocation41_spill] sm:$0xff] %v4719_v40  ;;  %v4731_v11 = vld [vmem:[%s3690_s10 + $0xd8] sm:$0xff]  ;;  %v4747_v60 = vmul.f32 %v2233_v2, %v4713_v33  ;;  %v4751_v50 = vmul.f32 %v4487_v36, %v4716_v9  ;;  %v4754_v38 = vmul.f32 %v2225_v24, %v4719_v40  ;;  %v974_v2 = vsub.s32 3, %v4433_v6  ;;  %s3270_s10 = scalar_lea.vmem %s3269_s0, 256 }
 0x293   : > { %5478 = vst [vmem:[#allocation42_spill] sm:$0xff] %v4731_v11  ;;  %v4761_v26 = vmul.f32 %v2229_v19, %v4731_v11  ;;  %v5481_v19 = vsub.s32 1, %v4433_v6  ;;  %v993_v40 = vsub.s32 4, %v4433_v6  ;;  %p3272_p13 = scmp.lt.s32.totalorder %s3270_s10, %s3264_s15 }
 0x294   : > { %5479 = vst [vmem:[#allocation43_spill] sm:$0xff] %v4754_v38 }
 0x295   : > { %5480 = vst [vmem:[#allocation44_spill] sm:$0xff] %v4761_v26  ;;  %p3273_p11 = por %p3272_p13, %p3271_p8 }
 0x297   : > { %p3274_p2 = pnand %p3273_p11, %p3267_p9 }
 0x2fe   : > { %v912_v9 = vpop.xlane.xlu0 %911 }
 0x2ff   : > { %3146 = vrcp.f32 %v912_v9 }
 0x309   : > { %v3147_v56 = vpop.eup %3146 }
 0x30a   : > { %v914_v41 = vmul.f32 %v3147_v56, %v4429_v37  ;;  %v955_v37 = vsub.s32 2, %v4433_v6 }
 0x30c   : > { %v937_v11 = vrot.slane %v914_v41, %v5481_v19  ;;  %v918_v33 = vrot.slane %v914_v41, %v4436_v12  ;;  %1067 = vst.msk [vmem:[%s364_s11] sm:$0xff] %vm903_vm1, %v914_v41  ;;  %v975_v24 = vrot.slane %v914_v41, %v974_v2  ;;  %v994_v9 = vrot.slane %v914_v41, %v993_v40 }
 0x30d   : > { %v956_v56 = vrot.slane %v914_v41, %v955_v37  ;;  %v1012_v12 = vsub.s32 5, %v4433_v6  ;;  %v1031_v2 = vsub.s32 6, %v4433_v6  ;;  %v1050_v40 = vsub.s32 7, %v4433_v6 }
 0x30e   : > { %939 = vbcast.lane.b32.xlu0 %v937_v11, 256  ;;  %920 = vbcast.lane.b32.xlu1 %v918_v33, 256 }
 0x30f   : > { %v1013_v19 = vrot.slane %v914_v41, %v1012_v12  ;;  %v1032_v36 = vrot.slane %v914_v41, %v1031_v2  ;;  %v1051_v37 = vrot.slane %v914_v41, %v1050_v40 }
 0x312   : > { %981 = vbcast.lane.b32.xlu0 %v975_v24, 264  ;;  %924 = vbcast.lane.b32.xlu1 %v918_v33, 264 }
 0x316   : > { %996 = vbcast.lane.b32.xlu0 %v994_v9, 256  ;;  %943 = vbcast.lane.b32.xlu1 %v937_v11, 264 }
 0x31a   : > { %932 = vbcast.lane.b32.xlu0 %v918_v33, 280  ;;  %958 = vbcast.lane.b32.xlu1 %v956_v56, 256 }
 0x31e   : > { %985 = vbcast.lane.b32.xlu0 %v975_v24, 272  ;;  %962 = vbcast.lane.b32.xlu1 %v956_v56, 264 }
 0x322   : > { %1019 = vbcast.lane.b32.xlu0 %v1013_v19, 264  ;;  %928 = vbcast.lane.b32.xlu1 %v918_v33, 272 }
 0x326   : > { %1004 = vbcast.lane.b32.xlu0 %v994_v9, 272  ;;  %947 = vbcast.lane.b32.xlu1 %v937_v11, 272 }
 0x32a   : > { %1038 = vbcast.lane.b32.xlu0 %v1032_v36, 264  ;;  %977 = vbcast.lane.b32.xlu1 %v975_v24, 256 }
 0x32e   : > { %1023 = vbcast.lane.b32.xlu0 %v1013_v19, 272  ;;  %966 = vbcast.lane.b32.xlu1 %v956_v56, 272 }
 0x332   : > { %1057 = vbcast.lane.b32.xlu0 %v1051_v37, 264  ;;  %1000 = vbcast.lane.b32.xlu1 %v994_v9, 264 }
 0x336   : > { %1042 = vbcast.lane.b32.xlu0 %v1032_v36, 272  ;;  %951 = vbcast.lane.b32.xlu1 %v937_v11, 280 }
 0x33a   : > { %1061 = vbcast.lane.b32.xlu0 %v1051_v37, 272  ;;  %1015 = vbcast.lane.b32.xlu1 %v1013_v19, 256 }
 0x33e   : > { %1065 = vbcast.lane.b32.xlu0 %v1051_v37, 280  ;;  %970 = vbcast.lane.b32.xlu1 %v956_v56, 280 }
 0x342   : > { %1034 = vbcast.lane.b32.xlu1 %v1032_v36, 256 }
 0x346   : > { %989 = vbcast.lane.b32.xlu1 %v975_v24, 280 }
 0x34a   : > { %1053 = vbcast.lane.b32.xlu1 %v1051_v37, 256 }
 0x34e   : > { %1008 = vbcast.lane.b32.xlu1 %v994_v9, 280 }
 0x352   : > { %1027 = vbcast.lane.b32.xlu1 %v1013_v19, 280 }
 0x356   : > { %1046 = vbcast.lane.b32.xlu1 %v1032_v36, 280 }
 0x357   : > { %3277 = shalt.err (!%p3274_p2)
}
 0x358   : > { %s3278_s30 = scalar_lea.hbm %s4791_s21, 128  ;;  %s3282_s23 = scalar_lea.hbm %s5156_s5, 256 }
 0x359   : > { %p3279_p7 = scmp.ne.s32.totalorder %s4791_s21, %s3278_s30  ;;  %p3283_p12 = scmp.lt.u32.totalorder %s4791_s21, %s5156_s5 }
 0x35a   : > { %p3284_p1 = scmp.lt.u32.totalorder %s3282_s23, %s3278_s30  ;;  %p3286_p10 = scmp.lt.u32.totalorder %s3278_s30, %s4791_s21 }
 0x35b   : > { %p3280_p5 = pnand %p3279_p7, %p5482_p3 }
 0x35c   : > { %p3285_p6 = por %p3284_p1, %p3283_p12 }
 0x35d   : > { %p3281_p0 = pneg %p3280_p5 }
 0x35e   : > { %p3287_p4 = por %p3286_p10, %p3285_p6 }
 0x360   : > { %p3288_p9 = pnand %p3287_p4, %p3281_p0 }
 0x362   : > { %3291 = shalt.err (!%p3288_p9)
}
 0x363   : > { %3058 = dma.vmem_to_hbm [thread:$0]  (%p5482_p3), %s2467_s8, 128, %s4791_s21, %s2443_s16   ;;  %v5483_v11 = vsub.f32 %v4497_v20, %v4494_v27  ;;  %v5484_v36 = vsub.f32 %v4470_v48, %v4476_v42  ;;  %v5485_v42 = vsub.f32 %v4529_v54, %v4526_v55  ;;  %v5486_v37 = vsub.f32 %v4470_v48, %v4479_v32 }
 0x364   : > { %s4828_s21 = scalar_lea.vmem [#allocation12], %s2680_s9  ;;  %v5487_v55 = vsub.f32 %v4517_v7, %v4514_v45  ;;  %v5488_v32 = vsub.f32 %v4497_v20, %v4533_v46  ;;  %v5490_v46 = vsub.f32 %v4570_v52, %v4567_v61  ;;  %v5492_v61 = vsub.f32 %v4570_v52, %v4573_v62  ;;  %s371_s18 = scalar_lea.vmem [#allocation10], %s3674_s14 }
 0x365   : > { %vm1180_vm2 = vcmask 1041409   ;;  %vm1182_vm3 = vcmask 1042434   ;;  %vm1184_vm4 = vcmask 1043459   ;;  %vm1186_vm5 = vcmask 1044484   ;;  %s2479_s9 = sshll.u32 %s371_s18, 4  ;;  %s2699_s8 = sshll.u32 %s3482_s28, 12  ;;  %s5074_s9 = int_to_ptr.vmem [resolvable:$true] %s2479_s9 }
 0x366   : > { %vm1188_vm6 = vcmask 1045509   ;;  %vm1190_vm7 = vcmask 1046534   ;;  %s2493_s16 = sshll.u32 %s4828_s21, 4  ;;  %vm1192_vm8 = vcmask 1047559   ;;  %s5072_s10 = scalar_lea.hbm %s5157_s6, %s2689_s29  ;;  %s5081_s16 = int_to_ptr.vmem [resolvable:$true] %s2493_s16 }
 0x367   : > { %s5079_s13 = scalar_lea.hbm %s5158_s7, %s2699_s8  ;;  %s5085_s11 = scalar_lea.sflag [#allocation11], %s312_s12 }
 0x368   : > { %s3292_s29 = scalar_lea.vmem %s5074_s9, 128  ;;  %s3417_s23 = smov [#allocation10]  }
 0x369   : > { %p3293_p8 = scmp.ne.s32.totalorder %s5074_s9, %s3292_s29  ;;  %s3296_s22 = sshll.u32 %s3417_s23, 4  ;;  %s3297_s22 = int_to_ptr.vmem [resolvable:$false] %s3296_s22 }
 0x36a   : > { %s3298_s17 = scalar_lea.vmem %s3297_s22, 256  ;;  %p3299_p2 = scmp.lt.s32.totalorder %s5074_s9, %s3297_s22 }
 0x36b   : > { %p3294_p13 = pnand %p3293_p8, %p5482_p3  ;;  %p3300_p7 = scmp.lt.s32.totalorder %s3298_s17, %s3292_s29 }
 0x36d   : > { %p3295_p11 = pneg %p3294_p13  ;;  %p3301_p5 = por %p3300_p7, %p3299_p2 }
 0x36f   : > { %p3302_p0 = pnand %p3301_p5, %p3295_p11 }
 0x380   : > { %v4813_v6 = vpop.permute.xlu0 %939  ;;  %v921_v33 = vpop.permute.xlu1 %920 }
 0x381   : > { %v2350_v41 = vmul.f32 %v5483_v11, %v4813_v6  ;;  %v2346_v24 = vmul.f32 %v5484_v36, %v921_v33  ;;  %v1068_v27 = vmul.f32 %v921_v33, %v4456_v35 }
 0x383   : > { %v2382_v9 = vadd.f32 %v2350_v41, %v4473_v51  ;;  %v2378_v56 = vadd.f32 %v2346_v24, %v4456_v35 }
 0x384   : > { %v4824_v12 = vpop.permute.xlu0 %981  ;;  %v925_v19 = vpop.permute.xlu1 %924 }
 0x385   : > { %2414 = vst [vmem:[%s4828_s21 + $0x20] sm:$0xff] %v2382_v9  ;;  %2410 = vst [vmem:[%s4828_s21] sm:$0xff] %v2378_v56  ;;  %v2359_v2 = vmul.f32 %v5485_v42, %v4824_v12  ;;  %v1069_v40 = vmul.f32 %v925_v19, %v4460_v5  ;;  %v2347_v11 = vmul.f32 %v5486_v37, %v925_v19 }
 0x387   : > { %v2391_v41 = vadd.f32 %v2359_v2, %v4508_v53  ;;  %v1100_v36 = vadd.f32 %v1069_v40, %v1068_v27  ;;  %v2379_v24 = vadd.f32 %v2347_v11, %v4460_v5  ;;  %v5489_v2 = vsub.f32 %v4470_v48, %v4544_v16 }
 0x388   : > { %v4843_v35 = vpop.permute.xlu0 %996  ;;  %v944_v33 = vpop.permute.xlu1 %943  ;;  %v5491_v16 = vsub.f32 %v4529_v54, %v4556_v17  ;;  %v5493_v17 = vsub.f32 %v4608_v34, %v4626_v22  ;;  %v5495_v22 = vsub.f32 %v4517_v7, %v4594_v30  ;;  %v5497_v30 = vsub.f32 %v4632_v0, %v4672_v47  ;;  %v5502_v47 = vld [vmem:[#allocation28_spill] sm:$0xff] }
 0x389   : > { %2423 = vst [vmem:[%s4828_s21 + $0x68] sm:$0xff] %v2391_v41  ;;  %2411 = vst [vmem:[%s4828_s21 + $0x8] sm:$0xff] %v2379_v24  ;;  %v2362_v9 = vmul.f32 %v5487_v55, %v4843_v35  ;;  %v2351_v56 = vmul.f32 %v5488_v32, %v944_v33 }
 0x38b   : > { %v2394_v19 = vadd.f32 %v2362_v9, %v4482_v21  ;;  %v2383_v5 = vadd.f32 %v2351_v56, %v4490_v23 }
 0x38c   : > { %v933_v27 = vpop.permute.xlu0 %932  ;;  %v4856_v42 = vpop.permute.xlu1 %958 }
 0x38d   : > { %2426 = vst [vmem:[%s4828_s21 + $0x80] sm:$0xff] %v2394_v19  ;;  %2415 = vst [vmem:[%s4828_s21 + $0x28] sm:$0xff] %v2383_v5  ;;  %v2349_v45 = vmul.f32 %v5489_v2, %v933_v27  ;;  %v2354_v40 = vmul.f32 %v5490_v46, %v4856_v42 }
 0x38f   : > { %v2381_v37 = vadd.f32 %v2349_v45, %v4503_v49  ;;  %v2386_v11 = vadd.f32 %v2354_v40, %v4536_v15  ;;  %v5494_v45 = vsub.f32 %v4470_v48, %v4580_v31  ;;  %v5496_v48 = vsub.f32 %v4497_v20, %v4598_v58  ;;  %v5498_v58 = vld [vmem:[#allocation25_spill] sm:$0xff] }
 0x390   : > { %v4869_v41 = vpop.permute.xlu0 %985  ;;  %v4871_v24 = vpop.permute.xlu1 %962 }
 0x391   : > { %2413 = vst [vmem:[%s4828_s21 + $0x18] sm:$0xff] %v2381_v37  ;;  %2418 = vst [vmem:[%s4828_s21 + $0x40] sm:$0xff] %v2386_v11  ;;  %v2360_v55 = vmul.f32 %v5491_v16, %v4869_v41  ;;  %v2355_v9 = vmul.f32 %v5492_v61, %v4871_v24 }
 0x393   : > { %v2392_v32 = vadd.f32 %v2360_v55, %v4520_v14  ;;  %v2387_v56 = vadd.f32 %v2355_v9, %v4539_v59 }
 0x394   : > { %v4885_v19 = vpop.permute.xlu0 %1019  ;;  %v929_v5 = vpop.permute.xlu1 %928 }
 0x395   : > { %2424 = vst [vmem:[%s4828_s21 + $0x70] sm:$0xff] %v2392_v32  ;;  %2419 = vst [vmem:[%s4828_s21 + $0x48] sm:$0xff] %v2387_v56  ;;  %v2367_v2 = vmul.f32 %v5493_v17, %v4885_v19  ;;  %v2348_v62 = vmul.f32 %v5494_v45, %v929_v5  ;;  %v1070_v40 = vmul.f32 %v929_v5, %v4548_v18 }
 0x396   : > { %v1071_v5 = vmul.f32 %v933_v27, %v4503_v49  ;;  %v5503_v27 = vsub.f32 %v4608_v34, %v5502_v47  ;;  %v5509_v47 = vld [vmem:[#allocation35_spill] sm:$0xff] }
 0x397   : > { %v2399_v46 = vadd.f32 %v2367_v2, %v4590_v3  ;;  %v2380_v37 = vadd.f32 %v2348_v62, %v4548_v18  ;;  %v1101_v61 = vadd.f32 %v1100_v36, %v1070_v40  ;;  %v5499_v36 = vsub.f32 %v4529_v54, %v5498_v58  ;;  %v5500_v62 = vld [vmem:[#allocation27_spill] sm:$0xff]  ;;  %v5501_v40 = vld [vmem:[#allocation22_spill] sm:$0xff] }
 0x398   : > { %v4899_v11 = vpop.permute.xlu0 %1004  ;;  %v948_v16 = vpop.permute.xlu1 %947 }
 0x399   : > { %2431 = vst [vmem:[%s4828_s21 + $0xa8] sm:$0xff] %v2399_v46  ;;  %2412 = vst [vmem:[%s4828_s21 + $0x10] sm:$0xff] %v2380_v37  ;;  %v2364_v55 = vmul.f32 %v5495_v22, %v4899_v11  ;;  %v2352_v31 = vmul.f32 %v5496_v48, %v948_v16  ;;  %v1102_v45 = vadd.f32 %v1101_v61, %v1071_v5  ;;  %v5504_v48 = vld [vmem:[#allocation29_spill] sm:$0xff]  ;;  %v5506_v5 = vld [vmem:[#allocation23_spill] sm:$0xff] }
 0x39b   : > { %v2396_v9 = vadd.f32 %v2364_v55, %v4559_v28  ;;  %v2384_v18 = vadd.f32 %v2352_v31, %v4562_v43  ;;  %v5505_v31 = vsub.f32 %v4570_v52, %v5504_v48 }
 0x39c   : > { %v4912_v32 = vpop.permute.xlu0 %1038  ;;  %v978_v56 = vpop.permute.xlu1 %977 }
 0x39d   : > { %2428 = vst [vmem:[%s4828_s21 + $0x90] sm:$0xff] %v2396_v9  ;;  %v2371_v17 = vmul.f32 %v5497_v30, %v4912_v32  ;;  %2416 = vst [vmem:[%s4828_s21 + $0x30] sm:$0xff] %v2384_v18  ;;  %v2358_v2 = vmul.f32 %v5499_v36, %v978_v56  ;;  %v1073_v9 = vmul.f32 %v944_v33, %v4490_v23  ;;  %v1103_v18 = vrot.slane %v1102_v45, 4 }
 0x39e   : > { %v5508_v23 = vsub.f32 %v4676_v39, %v4705_v4  ;;  %v5514_v4 = vld [vmem:[#allocation37_spill] sm:$0xff] }
 0x39f   : > { %v2403_v46 = vadd.f32 %v2371_v17, %v5500_v62  ;;  %v2390_v37 = vadd.f32 %v2358_v2, %v5501_v40  ;;  %v5507_v17 = vld [vmem:[#allocation24_spill] sm:$0xff] }
 0x3a0   : > { %v4926_v22 = vpop.permute.xlu0 %1023  ;;  %v967_v49 = vpop.permute.xlu1 %966 }
 0x3a1   : > { %2435 = vst [vmem:[%s4828_s21 + $0xc8] sm:$0xff] %v2403_v46  ;;  %v2368_v55 = vmul.f32 %v5503_v27, %v4926_v22  ;;  %2422 = vst [vmem:[%s4828_s21 + $0x60] sm:$0xff] %v2390_v37  ;;  %v2356_v61 = vmul.f32 %v5505_v31, %v967_v49  ;;  %v1072_v46 = vmul.f32 %v4813_v6, %v4473_v51  ;;  %v5512_v51 = vld [vmem:[#allocation26_spill] sm:$0xff] }
 0x3a2   : > { %v1074_v37 = vmul.f32 %v948_v16, %v4562_v43  ;;  %v5510_v27 = vsub.f32 %v4517_v7, %v5509_v47  ;;  %v1104_v31 = vadd.f32 %v1103_v18, %v1102_v45  ;;  %v5516_v47 = vld [vmem:[#allocation31_spill] sm:$0xff]  ;;  %v5517_v45 = vsub.f32 %v4497_v20, %v4688_v13 }
 0x3a3   : > { %v2400_v30 = vadd.f32 %v2368_v55, %v5506_v5  ;;  %v2388_v58 = vadd.f32 %v2356_v61, %v5507_v17  ;;  %v1109_v48 = vadd.f32 %v1073_v9, %v1072_v46  ;;  %v5511_v61 = vld [vmem:[#allocation34_spill] sm:$0xff]  ;;  %v5520_v20 = vsub.f32 %v4608_v34, %v4691_v8 }
 0x3a4   : > { %v4940_v36 = vpop.permute.xlu0 %1057  ;;  %v4942_v2 = vpop.permute.xlu1 %1000  ;;  %v1105_v18 = vrot.slane %v1104_v31, 2  ;;  %v5518_v46 = vld [vmem:[#allocation30_spill] sm:$0xff]  ;;  %v1077_v8 = vmul.f32 %v4871_v24, %v4539_v59 }
 0x3a5   : > { %2432 = vst [vmem:[%s4828_s21 + $0xb0] sm:$0xff] %v2400_v30  ;;  %v2375_v33 = vmul.f32 %v5508_v23, %v4940_v36  ;;  %2420 = vst [vmem:[%s4828_s21 + $0x50] sm:$0xff] %v2388_v58  ;;  %v2363_v55 = vmul.f32 %v5510_v27, %v4942_v2  ;;  %v1110_v30 = vadd.f32 %v1109_v48, %v1074_v37 }
 0x3a6   : > { %v5515_v58 = vsub.f32 %v4632_v0, %v5514_v4  ;;  %v5519_v4 = vsub.f32 %v4676_v39, %v4710_v44  ;;  %v5523_v44 = vsub.f32 %v4676_v39, %v4726_v1  ;;  %v1076_v1 = vmul.f32 %v4856_v42, %v4536_v15 }
 0x3a7   : > { %v2407_v26 = vadd.f32 %v2375_v33, %v5511_v61  ;;  %v2395_v43 = vadd.f32 %v2363_v55, %v5512_v51  ;;  %v1082_v15 = vmul.f32 %v4869_v41, %v4520_v14  ;;  %v1084_v41 = vmul.f32 %v4843_v35, %v4482_v21 }
 0x3a8   : > { %v4959_v6 = vpop.permute.xlu0 %1042  ;;  %v952_v16 = vpop.permute.xlu1 %951  ;;  %v1089_v21 = vmul.f32 %v4885_v19, %v4590_v3  ;;  %v5532_v19 = vsub.f32 %v4517_v7, %v4751_v50 }
 0x3a9   : > { %5513 = vst [vmem:[#allocation45_spill] sm:$0xff] %v4959_v6  ;;  %2439 = vst [vmem:[%s4828_s21 + $0xe8] sm:$0xff] %v2407_v26  ;;  %v2372_v23 = vmul.f32 %v5515_v58, %v4959_v6  ;;  %v1075_v27 = vmul.f32 %v952_v16, %v5516_v47  ;;  %v2353_v9 = vmul.f32 %v5517_v45, %v952_v16 }
 0x3aa   : > { %2427 = vst [vmem:[%s4828_s21 + $0x88] sm:$0xff] %v2395_v43  ;;  %v1106_v43 = vadd.f32 %v1105_v18, %v1104_v31  ;;  %v5524_v31 = vsub.f32 %v4570_v52, %v4694_v63  ;;  %v5527_v63 = vsub.f32 %v4632_v0, %v4738_v57 }
 0x3ab   : > { %v2404_v33 = vadd.f32 %v2372_v23, %v5518_v46  ;;  %v1111_v55 = vadd.f32 %v1110_v30, %v1075_v27  ;;  %v2385_v38 = vadd.f32 %v2353_v9, %v5516_v47  ;;  %v5521_v30 = vld [vmem:[#allocation36_spill] sm:$0xff] }
 0x3ac   : > { %v1062_v26 = vpop.permute.xlu0 %1061  ;;  %v1016_v37 = vpop.permute.xlu1 %1015  ;;  %v5522_v47 = vld [vmem:[#allocation32_spill] sm:$0xff] }
 0x3ad   : > { %2436 = vst [vmem:[%s4828_s21 + $0xd0] sm:$0xff] %v2404_v33  ;;  %v1112_v48 = vrot.slane %v1111_v55, 4  ;;  %2417 = vst [vmem:[%s4828_s21 + $0x38] sm:$0xff] %v2385_v38  ;;  %v2376_v58 = vmul.f32 %v5519_v4, %v1062_v26  ;;  %v2366_v13 = vmul.f32 %v5520_v20, %v1016_v37  ;;  %v1080_v33 = vmul.f32 %v978_v56, %v5501_v40  ;;  %v5526_v20 = vld [vmem:[#allocation33_spill] sm:$0xff] }
 0x3ae   : > { %v1107_v56 = vrot.slane %v1106_v43, 1 }
 0x3af   : > { %v1113_v16 = vadd.f32 %v1112_v48, %v1111_v55  ;;  %v2408_v23 = vadd.f32 %v2376_v58, %v5521_v30  ;;  %v2398_v27 = vadd.f32 %v2366_v13, %v5522_v47  ;;  %v1081_v55 = vmul.f32 %v4824_v12, %v4508_v53  ;;  %v5525_v48 = vld [vmem:[#allocation38_spill] sm:$0xff] }
 0x3b0   : > { %v1066_v45 = vpop.permute.xlu0 %1065  ;;  %v971_v9 = vpop.permute.xlu1 %970  ;;  %v1078_v58 = vmul.f32 %v967_v49, %v5507_v17  ;;  %v1118_v12 = vadd.f32 %v1077_v8, %v1076_v1  ;;  %v1108_v42 = vadd.f32 %v1107_v56, %v1106_v43 }
 0x3b1   : > { %v1114_v6 = vrot.slane %v1113_v16, 2  ;;  %2440 = vst [vmem:[%s4828_s21 + $0xf0] sm:$0xff] %v2408_v23  ;;  %v2377_v38 = vmul.f32 %v5523_v44, %v1066_v45  ;;  %2430 = vst [vmem:[%s4828_s21 + $0xa0] sm:$0xff] %v2398_v27  ;;  %v2357_v18 = vmul.f32 %v5524_v31, %v971_v9  ;;  %v1127_v13 = vadd.f32 %v1081_v55, %v1080_v33  ;;  %v5529_v55 = vld [vmem:[#allocation39_spill] sm:$0xff] }
 0x3b2   : > { %v1085_v23 = vmul.f32 %v4942_v2, %v5512_v51  ;;  %v5528_v44 = vsub.f32 %v4529_v54, %v4742_v25  ;;  %v1097_v51 = vmul.f32 %v4940_v36, %v5511_v61  ;;  %v5530_v54 = vsub.f32 %v4676_v39, %v4747_v60  ;;  %v5531_v60 = vld [vmem:[#allocation40_spill] sm:$0xff] }
 0x3b3   : > { %v1115_v40 = vadd.f32 %v1114_v6, %v1113_v16  ;;  %v2409_v4 = vadd.f32 %v2377_v38, %v5525_v48  ;;  %v2389_v59 = vadd.f32 %v2357_v18, %v5526_v20  ;;  %v1079_v6 = vmul.f32 %v971_v9, %v5526_v20 }
 0x3b4   : > { %v1035_v24 = vpop.permute.xlu1 %1034  ;;  %v1119_v16 = vadd.f32 %v1118_v12, %v1078_v58  ;;  %v1128_v33 = vadd.f32 %v1127_v13, %v1082_v15  ;;  %v1136_v31 = vadd.f32 %v1085_v23, %v1084_v41  ;;  %v1088_v18 = vmul.f32 %v1016_v37, %v5522_v47 }
 0x3b5   : > { %v1116_v52 = vrot.slane %v1115_v40, 1  ;;  %2441 = vst [vmem:[%s4828_s21 + $0xf8] sm:$0xff] %v2409_v4  ;;  %v2370_v53 = vmul.f32 %v5527_v63, %v1035_v24  ;;  %2421 = vst [vmem:[%s4828_s21 + $0x58] sm:$0xff] %v2389_v59  ;;  %v1099_v58 = vmul.f32 %v1066_v45, %v5525_v48  ;;  %v1093_v45 = vmul.f32 %v4912_v32, %v5500_v62  ;;  %v5536_v32 = vld [vmem:[#allocation45_spill] sm:$0xff] }
 0x3b6   : > { %v1120_v43 = vadd.f32 %v1119_v16, %v1079_v6  ;;  %v1145_v1 = vadd.f32 %v1089_v21, %v1088_v18  ;;  %v1094_v62 = vmul.f32 %v5536_v32, %v5518_v46 }
 0x3b7   : > { %v1117_v49 = vadd.f32 %v1116_v52, %v1115_v40  ;;  %v2402_v17 = vadd.f32 %v2370_v53, %v4697_v10  ;;  %v1098_v40 = vmul.f32 %v1062_v26, %v5521_v30  ;;  %v1090_v26 = vmul.f32 %v4926_v22, %v5506_v5  ;;  %v5534_v22 = vld [vmem:[#allocation43_spill] sm:$0xff] }
 0x3b8   : > { %v990_v27 = vpop.permute.xlu1 %989  ;;  %v1121_v35 = vrot.slane %v1120_v43, 4  ;;  %v5535_v5 = vsub.f32 %v4608_v34, %v5534_v22  ;;  %v5538_v34 = vld [vmem:[#allocation44_spill] sm:$0xff] }
 0x3b9   : > { %v5012_v57 = vsel %vm1180_vm2, %v1117_v49, %v1108_v42  ;;  %2434 = vst [vmem:[%s4828_s21 + $0xc0] sm:$0xff] %v2402_v17  ;;  %v1083_v9 = vmul.f32 %v990_v27, %v4700_v29  ;;  %v2361_v14 = vmul.f32 %v5528_v44, %v990_v27  ;;  %v1146_v12 = vadd.f32 %v1145_v1, %v1090_v26 }
 0x3ba   : > { %v1122_v3 = vadd.f32 %v1121_v35, %v1120_v43  ;;  %v5539_v43 = vsub.f32 %v4632_v0, %v5538_v34 }
 0x3bb   : > { %v1129_v38 = vadd.f32 %v1128_v33, %v1083_v9  ;;  %v2393_v8 = vadd.f32 %v2361_v14, %v4700_v29  ;;  %v1086_v29 = vmul.f32 %v4899_v11, %v4559_v28  ;;  %v1092_v28 = vmul.f32 %v1035_v24, %v4697_v10  ;;  %v5533_v10 = vld [vmem:[#allocation41_spill] sm:$0xff]  ;;  %v5537_v14 = vld [vmem:[#allocation42_spill] sm:$0xff] }
 0x3bc   : > { %v1054_v2 = vpop.permute.xlu1 %1053  ;;  %v1123_v7 = vrot.slane %v1122_v3, 2 }
 0x3bd   : > { %2425 = vst [vmem:[%s4828_s21 + $0x78] sm:$0xff] %v2393_v8  ;;  %v1096_v56 = vmul.f32 %v1054_v2, %v5529_v55  ;;  %v2374_v25 = vmul.f32 %v5530_v54, %v1054_v2  ;;  %v1130_v36 = vrot.slane %v1129_v38, 4  ;;  %v1137_v47 = vadd.f32 %v1136_v31, %v1086_v29 }
 0x3be   : > { %v1154_v50 = vadd.f32 %v1093_v45, %v1092_v28  ;;  %v1124_v9 = vadd.f32 %v1123_v7, %v1122_v3 }
 0x3bf   : > { %v1163_v61 = vadd.f32 %v1097_v51, %v1096_v56  ;;  %v2406_v37 = vadd.f32 %v2374_v25, %v5529_v55  ;;  %v1131_v30 = vadd.f32 %v1130_v36, %v1129_v38 }
 0x3c0   : > { %v1009_v4 = vpop.permute.xlu1 %1008  ;;  %v1155_v44 = vadd.f32 %v1154_v50, %v1094_v62  ;;  %v1125_v56 = vrot.slane %v1124_v9, 1 }
 0x3c1   : > { %v1164_v39 = vadd.f32 %v1163_v61, %v1098_v40  ;;  %2438 = vst [vmem:[%s4828_s21 + $0xe0] sm:$0xff] %v2406_v37  ;;  %v1087_v20 = vmul.f32 %v1009_v4, %v5531_v60  ;;  %v2365_v11 = vmul.f32 %v5532_v19, %v1009_v4  ;;  %v1132_v15 = vrot.slane %v1131_v30, 2 }
 0x3c2   : > { %v1126_v0 = vadd.f32 %v1125_v56, %v1124_v9 }
 0x3c3   : > { %v1165_v59 = vadd.f32 %v1164_v39, %v1099_v58  ;;  %v1138_v13 = vadd.f32 %v1137_v47, %v1087_v20  ;;  %v2397_v48 = vadd.f32 %v2365_v11, %v5531_v60  ;;  %v1133_v8 = vadd.f32 %v1132_v15, %v1131_v30 }
 0x3c4   : > { %v1028_v52 = vpop.permute.xlu1 %1027  ;;  %v1183_v39 = vsel %vm1182_vm3, %v1126_v0, %v5012_v57 }
 0x3c5   : > { %v1166_v63 = vrot.slane %v1165_v59, 4  ;;  %v1139_v53 = vrot.slane %v1138_v13, 4  ;;  %v1091_v24 = vmul.f32 %v1028_v52, %v5533_v10  ;;  %2429 = vst [vmem:[%s4828_s21 + $0x98] sm:$0xff] %v2397_v48  ;;  %v2369_v6 = vmul.f32 %v5535_v5, %v1028_v52 }
 0x3c6   : > { %v1134_v25 = vrot.slane %v1133_v8, 1 }
 0x3c7   : > { %v1140_v42 = vadd.f32 %v1139_v53, %v1138_v13  ;;  %v1147_v49 = vadd.f32 %v1146_v12, %v1091_v24  ;;  %v2401_v17 = vadd.f32 %v2369_v6, %v5533_v10  ;;  %v1167_v23 = vadd.f32 %v1166_v63, %v1165_v59 }
 0x3c8   : > { %v1047_v16 = vpop.permute.xlu1 %1046  ;;  %v1135_v37 = vadd.f32 %v1134_v25, %v1133_v8 }
 0x3c9   : > { %v1141_v27 = vrot.slane %v1140_v42, 2  ;;  %v1148_v33 = vrot.slane %v1147_v49, 4  ;;  %2433 = vst [vmem:[%s4828_s21 + $0xb8] sm:$0xff] %v2401_v17  ;;  %v1095_v41 = vmul.f32 %v1047_v16, %v5537_v14  ;;  %v2373_v38 = vmul.f32 %v5539_v43, %v1047_v16 }
 0x3ca   : > { %v1168_v18 = vrot.slane %v1167_v23, 2  ;;  %v1185_v20 = vsel %vm1184_vm4, %v1135_v37, %v1183_v39 }
 0x3cb   : > { %v1149_v31 = vadd.f32 %v1148_v33, %v1147_v49  ;;  %v1142_v2 = vadd.f32 %v1141_v27, %v1140_v42  ;;  %v1156_v46 = vadd.f32 %v1155_v44, %v1095_v41  ;;  %v2405_v51 = vadd.f32 %v2373_v38, %v5537_v14 }
 0x3cc   : > { %v1169_v40 = vadd.f32 %v1168_v18, %v1167_v23 }
 0x3cd   : > { %v1150_v55 = vrot.slane %v1149_v31, 2  ;;  %v1157_v54 = vrot.slane %v1156_v46, 4  ;;  %2437 = vst [vmem:[%s4828_s21 + $0xd8] sm:$0xff] %v2405_v51  ;;  %v1143_v29 = vrot.slane %v1142_v2, 1 }
 0x3ce   : > { %v1170_v1 = vrot.slane %v1169_v40, 1 }
 0x3cf   : > { %v1151_v21 = vadd.f32 %v1150_v55, %v1149_v31  ;;  %v1158_v35 = vadd.f32 %v1157_v54, %v1156_v46  ;;  %v1144_v47 = vadd.f32 %v1143_v29, %v1142_v2 }
 0x3d0   : > { %v1171_v19 = vadd.f32 %v1170_v1, %v1169_v40 }
 0x3d1   : > { %v1152_v36 = vrot.slane %v1151_v21, 1  ;;  %v1159_v61 = vrot.slane %v1158_v35, 2  ;;  %v1187_v3 = vsel %vm1186_vm5, %v1144_v47, %v1185_v20 }
 0x3d3   : > { %v1160_v4 = vadd.f32 %v1159_v61, %v1158_v35  ;;  %v1153_v58 = vadd.f32 %v1152_v36, %v1151_v21 }
 0x3d5   : > { %v1161_v60 = vrot.slane %v1160_v4, 1  ;;  %v1189_v11 = vsel %vm1188_vm6, %v1153_v58, %v1187_v3 }
 0x3d7   : > { %v1162_v28 = vadd.f32 %v1161_v60, %v1160_v4 }
 0x3d9   : > { %v1191_v57 = vsel %vm1190_vm7, %v1162_v28, %v1189_v11 }
 0x3da   : > { %v1193_v26 = vsel %vm1192_vm8, %v1171_v19, %v1191_v57 }
 0x3db   : > { %1195 = vst [vmem:[%s371_s18] sm:$0xff] %v1193_v26 }
 0x3dc   : > { %3305 = shalt.err (!%p3302_p0)
}
 0x3dd   : > { %s3306_s28 = scalar_lea.hbm %s5072_s10, 128  ;;  %s3310_s18 = scalar_lea.hbm %s5157_s6, 256 }
 0x3de   : > { %p3307_p12 = scmp.ne.s32.totalorder %s5072_s10, %s3306_s28  ;;  %p3311_p10 = scmp.lt.u32.totalorder %s5072_s10, %s5157_s6 }
 0x3df   : > { %p3312_p4 = scmp.lt.u32.totalorder %s3310_s18, %s3306_s28  ;;  %p3314_p8 = scmp.lt.u32.totalorder %s3306_s28, %s5072_s10 }
 0x3e0   : > { %p3308_p1 = pnand %p3307_p12, %p5482_p3 }
 0x3e1   : > { %p3313_p9 = por %p3312_p4, %p3311_p10 }
 0x3e2   : > { %p3309_p6 = pneg %p3308_p1 }
 0x3e3   : > { %p3315_p13 = por %p3314_p8, %p3313_p9 }
 0x3e5   : > { %p3316_p11 = pnand %p3315_p13, %p3309_p6 }
 0x3e7   : > { %3319 = shalt.err (!%p3316_p11)
}
 0x3e8   : > { %3059 = dma.vmem_to_hbm [thread:$0]  (%p5482_p3), %s5074_s9, 128, %s5072_s10, %s5085_s11  }
 0x3e9   : > { %s3320_s0 = scalar_lea.vmem %s5081_s16, 4096  ;;  %s3418_s14 = smov [#allocation12]  }
 0x3ea   : > { %p3321_p2 = scmp.ne.s32.totalorder %s5081_s16, %s3320_s0  ;;  %s3324_s30 = sshll.u32 %s3418_s14, 4  ;;  %s3325_s30 = int_to_ptr.vmem [resolvable:$false] %s3324_s30 }
 0x3eb   : > { %s3326_s29 = scalar_lea.vmem %s3325_s30, 8192  ;;  %p3327_p0 = scmp.lt.s32.totalorder %s5081_s16, %s3325_s30 }
 0x3ec   : > { %p3322_p7 = pnand %p3321_p2, %p5482_p3  ;;  %p3328_p12 = scmp.lt.s32.totalorder %s3326_s29, %s3320_s0 }
 0x3ee   : > { %p3323_p5 = pneg %p3322_p7  ;;  %p3329_p1 = por %p3328_p12, %p3327_p0 }
 0x3f0   : > { %p3330_p6 = pnand %p3329_p1, %p3323_p5 }
 0x3f2   : > { %3333 = shalt.err (!%p3330_p6)
}
 0x3f3   : > { %s3334_s9 = scalar_lea.hbm %s5079_s13, 4096  ;;  %s3338_s22 = scalar_lea.hbm %s5158_s7, 8192 }
 0x3f4   : > { %p3335_p10 = scmp.ne.s32.totalorder %s5079_s13, %s3334_s9  ;;  %p3339_p8 = scmp.lt.u32.totalorder %s5079_s13, %s5158_s7 }
 0x3f5   : > { %p3340_p13 = scmp.lt.u32.totalorder %s3338_s22, %s3334_s9  ;;  %p3342_p2 = scmp.lt.u32.totalorder %s3334_s9, %s5079_s13 }
 0x3f6   : > { %p3336_p4 = pnand %p3335_p10, %p5482_p3 }
 0x3f7   : > { %p3341_p11 = por %p3340_p13, %p3339_p8 }
 0x3f8   : > { %p3337_p9 = pneg %p3336_p4 }
 0x3f9   : > { %p3343_p7 = por %p3342_p2, %p3341_p11 }
 0x3fb   : > { %p3344_p5 = pnand %p3343_p7, %p3337_p9 }
 0x3fd   : > { %3347 = shalt.err (!%p3344_p5)
}
 0x3fe   : > { %s3419_s12 = smov 128   ;;  %s3420_s21 = smov 8  }
 0x3ff   : > { %3060 = dma.vmem_to_hbm [thread:$0]  (%p5482_p3), %s5081_s16, 4096, %s5079_s13, %s5085_s11, %s3419_s12, %s3419_s12, %s3420_s21  }
 0x400 PF: > { %s5540_s18 = sld [smem:[#allocation19_spill]]  ;;  %s2508_s8 = sand.u32 1, %s3390_s24  }
 0x401   : > { %p5542_p12 = scmp.ge.s32.totalorder %s3402_s27, 2  ;;  %s2509_s15 = scalar_lea.sflag [#allocation4], %s2508_s8 }
 0x406   : > { %p5541_p0 = scmp.ne.s32.totalorder %s5540_s18, 0 }
 0x408   : > { %p3079_p1 = pnand %p5542_p12, %p5541_p0 }
 0x40a   : > { %3381 = dma.done.wait (!%p3079_p1), %s2509_s15, 128  }
 0x40b   : > { %3383 = vsyncadd (!%p3079_p1), %s2509_s15, 4294967168  ;;  %s5543_s0 = sadd.s32 4294967294, %s3402_s27  }
 0x40c   : > { %s2517_s14 = sand.u32 1, %s5543_s0  }
 0x40d   : > { %s2518_s30 = scalar_lea.sflag [#allocation11], %s2517_s14 }
 0x40e   : > { %3385 = dma.done.wait (!%p3079_p1), %s2518_s30, 4224  }
 0x40f   : > { %3387 = vsyncadd (!%p3079_p1), %s2518_s30, 4294963072  ;;  %s5544_s27 = sld [smem:[#allocation20_spill]]  ;;  %s5545_s24 = smov %s3394_s25 }
 0x410   : > { %s5546_s25 = smov %s3398_s26  ;;  %s5547_s26 = smov %s3559_s19 }
 0x415   : > { %p25_p3 = scmp.ge.s32.totalorder %s5544_s27, 4  }
 0x417   :  { %27 = sbr.rel (!%p25_p3) target bundleno = 10 (0xa), region = 136 }
 0x41e   :  { %2532 = vsyncpa [#allocation3], 1 }
 0x41f   :  { %2534 = vsyncpa [#allocation3 + $0x1], 1 }
 0x420   :  { %2535 = vsyncpa [#allocation6], 1 }
 0x421   :  { %2536 = vsyncpa [#allocation4], 1 }
 0x422   :  { %2538 = vsyncpa [#allocation4 + $0x1], 1 }
 0x423   :  { %2539 = vsyncpa [#allocation11], 1 }
 0x424   :  { %2541 = vsyncpa [#allocation11 + $0x1], 1 }

</bundles_post_ra>
